<compile_context>
chip_gen: v6e
topology: v6e:2x2x1
jax: 0.10.0
libtpu: 0.0.40
codegen_flags: <defaults>
</compile_context>

<pallas_src>
import functools

import jax
import jax.numpy as jnp
from jax.experimental import pallas as pl
from jax.experimental.pallas import tpu as pltpu


# ---------------------------------------------------------------------------
# Activations.  torch.nn.GELU() is the exact erf-based GELU; erf is built from
# an Abramowitz & Stegun polynomial (|err| <= 1.5e-7).  The divide goes to the
# EUP via pl.reciprocal(approx=True).
# ---------------------------------------------------------------------------
_SQRT_HALF = 0.7071067811865476


def _erf_approx(x):
    a1, a2, a3, a4, a5 = 0.254829592, -0.284496736, 1.421413741, -1.453152027, 1.061405429
    p = 0.3275911
    ax = jnp.abs(x)
    t = pl.reciprocal(1.0 + p * ax, approx=True)     # EUP slot, ~free
    poly = ((((a5 * t + a4) * t + a3) * t + a2) * t + a1) * t
    y = 1.0 - poly * jnp.exp(-ax * ax)
    return jnp.where(x >= 0, y, -y)


def _gelu_exact(x):
    return 0.5 * x * (1.0 + _erf_approx(x * _SQRT_HALF))


def _act_fn(act_type):
    if act_type is None:
        return lambda x: x
    assert act_type in ("GELU", "ReLU", "SiLU")
    if act_type == "ReLU":
        return lambda x: jnp.maximum(x, 0.0)
    if act_type == "SiLU":
        return lambda x: x * jax.nn.sigmoid(x)
    return _gelu_exact


def _pick_row_tile(h, row_tile):
    if row_tile is not None:
        assert h % row_tile == 0, (h, row_tile)
        return row_tile
    if h <= 32:
        return h
    for cand in (32, 16, 8):
        if h % cand == 0:
            return cand
    return h


# ---------------------------------------------------------------------------
# Fused kernel: one (batch, row-tile) per grid step.
# Pixels ride the sublane axis, channels ride the lane axis, so the 1x1 convs
# are MXU matmuls and the depthwise 3x3 is sublane-shifted FMAs over a
# zero-padded slab kept in a persistent VMEM scratch.
# ---------------------------------------------------------------------------
def _lfe_kernel(x_ref, w1_ref, b1_ref, dww_ref, dwb_ref, w2_ref, b2_ref,
                o_ref, slab_ref, *, H, W, TH, ksize, act, mxu_dtype):
    C = x_ref.shape[-1]
    F = w1_ref.shape[-1]
    r = ksize // 2
    THW = TH * W
    halo = r * W
    pad_rows = (slab_ref.shape[0] - THW) // 2        # multiple of 8, >= r*W + r
    j = pl.program_id(1)
    n_tiles = pl.num_programs(1)

    w1 = w1_ref[...]                                 # (C, F)  mxu_dtype (bf16)
    b1 = b1_ref[...]                                 # (1, F)  f32

    def fc1(rows):
        """(1, R, W, C) image rows -> (R*W, F) f32 fc1 output (MXU, f32 acc)."""
        xm = rows.reshape(-1, C).astype(mxu_dtype)
        return jnp.dot(xm, w1, preferred_element_type=jnp.float32) + b1

    # ---- fc1 written straight into the persistent zero-padded slab ----------
    # Pad strips are re-zeroed every step (cheap: 2*pad_rows rows) so the kernel
    # is correct regardless of how the 'parallel' grid is split across cores.
    if pad_rows > 0:
        zpad = jnp.zeros((pad_rows, F), jnp.float32)
        slab_ref[pl.ds(0, pad_rows), :] = zpad
        slab_ref[pl.ds(pad_rows + THW, pad_rows), :] = zpad

    slab_ref[pl.ds(pad_rows, THW), :] = fc1(x_ref[:, pl.ds(j * TH, TH), :, :])

    if halo > 0:
        @pl.when(j > 0)
        def _():  # top halo: fc1 recomputed on the r image rows above this tile
            slab_ref[pl.ds(pad_rows - halo, halo), :] = fc1(
                x_ref[:, pl.ds(j * TH - r, r), :, :])

        @pl.when(j < n_tiles - 1)
        def _():  # bottom halo: fc1 recomputed on the r image rows below this tile
            slab_ref[pl.ds(pad_rows + THW, halo), :] = fc1(
                x_ref[:, pl.ds((j + 1) * TH, r), :, :])

    # ---- depthwise ksize x ksize conv, taps grouped by column offset dw -----
    # For a fixed dw the horizontal-wrap mask depends only on the output column,
    # so it is applied once to a dw-shifted slab; the ksize row taps are then
    # aligned sublane slices (kh*W offsets) of that pre-masked slab.
    slab_rows = THW + 2 * halo
    dww = dww_ref[...]                               # (ksize*ksize, F) f32
    col = jax.lax.broadcasted_iota(jnp.int32, (slab_rows, 1), 0) % W

    acc = None
    for kw in range(ksize):
        dw = kw - r
        shifted = slab_ref[pl.ds(pad_rows - halo + dw, slab_rows), :]
        if dw < 0:
            shifted = jnp.where(col >= -dw, shifted, 0.0)
        elif dw > 0:
            shifted = jnp.where(col < (W - dw), shifted, 0.0)
        for kh in range(ksize):
            tap = kh * ksize + kw
            term = shifted[kh * W:kh * W + THW, :] * dww[tap:tap + 1, :]
            acc = term if acc is None else acc + term
    acc = acc + dwb_ref[...]

    a = act(acc)                                     # f32 elementwise (VPU/EUP)

    # ---- fc2 (1x1 conv).  Dropout(p=0.0) is the identity. -------------------
    y = jnp.dot(a.astype(mxu_dtype), w2_ref[...],
                preferred_element_type=jnp.float32) + b2_ref[...]
    o_ref[...] = y.reshape(o_ref.shape).astype(o_ref.dtype)


def lfe_forward(x, params, *, kernel_size=3, act_type="GELU", row_tile=None,
                mxu_dtype=jnp.bfloat16):
    n, h, w, c = x.shape
    w1 = params["w1"]
    f = w1.shape[1]
    kk = kernel_size * kernel_size
    r = kernel_size // 2
    assert w1.shape == (c, f)
    assert params["dww"].shape == (kk, f)

    th = _pick_row_tile(h, row_tile)
    n_ht = h // th
    thw = th * w
    pad_rows = ((r * (w + 1) + 7) // 8) * 8          # multiple of 8, >= r*W + r

    # MXU operands in bf16 (f32 accumulation); biases / depthwise weights stay f32.
    w1_m = w1.astype(mxu_dtype)
    w2_m = params["w2"].astype(mxu_dtype)

    kernel = functools.partial(
        _lfe_kernel, H=h, W=w, TH=th, ksize=kernel_size,
        act=_act_fn(act_type), mxu_dtype=mxu_dtype)

    # Advisory cost estimate (helps XLA schedule around the custom call).
    flops = 4 * n * h * w * c * f + (2 * kk + 12) * n * h * w * f
    transcendentals = 2 * n * h * w * f
    param_bytes = int(
        w1_m.size * w1_m.dtype.itemsize + w2_m.size * w2_m.dtype.itemsize
        + sum(params[k].size * params[k].dtype.itemsize
              for k in ("b1", "dww", "dwb", "b2")))
    cost = pl.CostEstimate(
        flops=int(flops), transcendentals=int(transcendentals),
        bytes_accessed=int(2 * x.size * x.dtype.itemsize + param_bytes))

    # Explicit VMEM budget: double-buffered x/out blocks + params, the padded
    # slab scratch, and generous headroom for in-kernel f32 temporaries.
    slab_bytes = (thw + 2 * pad_rows) * f * 4
    blk_bytes = (h * w * c + th * w * c) * x.dtype.itemsize
    temp_bytes = 10 * thw * f * 4
    need = 2 * (blk_bytes + param_bytes) + slab_bytes + temp_bytes + (2 << 20)
    vmem_limit = int(min(64 * 1024 * 1024, max(need, 16 * 1024 * 1024)))

    return pl.pallas_call(
        kernel,
        out_shape=jax.ShapeDtypeStruct((n, h, w, c), x.dtype),
        grid_spec=pltpu.PrefetchScalarGridSpec(
            num_scalar_prefetch=0,
            grid=(n, n_ht),          # (batch, row-tile); both 'parallel'
            in_specs=[
                # Full image stays resident across the row-tile axis (index_map
                # ignores j); intermediates are tile-sized.
                pl.BlockSpec((1, h, w, c), lambda i, j: (i, 0, 0, 0)),
                # Parameters: full untiled blocks with constant index maps ->
                # DMA'd into VMEM once and kept resident.
                pl.BlockSpec((c, f), lambda i, j: (0, 0)),
                pl.BlockSpec((1, f), lambda i, j: (0, 0)),
                pl.BlockSpec((kk, f), lambda i, j: (0, 0)),
                pl.BlockSpec((1, f), lambda i, j: (0, 0)),
                pl.BlockSpec((f, c), lambda i, j: (0, 0)),
                pl.BlockSpec((1, c), lambda i, j: (0, 0)),
            ],
            out_specs=pl.BlockSpec((1, th, w, c), lambda i, j: (i, j, 0, 0)),
            scratch_shapes=[pltpu.VMEM((thw + 2 * pad_rows, f), jnp.float32)],
        ),
        compiler_params=pltpu.CompilerParams(
            dimension_semantics=("parallel", "parallel"),
            vmem_limit_bytes=vmem_limit,
        ),
        cost_estimate=cost,
    )(x, w1_m, params["b1"], params["dww"], params["dwb"], w2_m, params["b2"])


class LFE:
    """JAX/Pallas equivalent of the PyTorch LFE module (forward pass)."""

    def __init__(self, dim, kernel_size=3, act_type="GELU", ffn_drop=0.0, *, key=None):
        self.embed_dims = dim
        self.feedforward_channels = int(dim * 4)
        self.kernel_size = kernel_size
        self.act_type = act_type
        self.ffn_drop = ffn_drop  # 0.0 (and eval mode) == identity

        f = self.feedforward_channels
        key = jax.random.PRNGKey(0) if key is None else key
        k1, k2, k3, k4, k5, k6 = jax.random.split(key, 6)
        s = 0.3
        self.params = dict(
            # w1[c, f] == torch fc1.weight[f, c, 0, 0]
            w1=(jax.random.normal(k1, (dim, f)) * s).astype(jnp.float32),
            b1=(jax.random.normal(k2, (1, f)) * 0.1).astype(jnp.float32),
            # dww[kh*ksize + kw, f]: depthwise tap for spatial offset (kh-r, kw-r)
            # in this module's (H, W) channels-last convention.
            dww=(jax.random.normal(k3, (kernel_size * kernel_size, f)) * s).astype(jnp.float32),
            dwb=(jax.random.normal(k4, (1, f)) * 0.1).astype(jnp.float32),
            # w2[f, c] == torch fc2.weight[c, f, 0, 0]
            w2=(jax.random.normal(k5, (f, dim)) * s).astype(jnp.float32),
            b2=(jax.random.normal(k6, (1, dim)) * 0.1).astype(jnp.float32),
        )

    def __call__(self, x, *, row_tile=None):
        assert x.ndim == 4 and x.shape[-1] == self.embed_dims
        return lfe_forward(x, self.params, kernel_size=self.kernel_size,
                           act_type=self.act_type, row_tile=row_tile)


# ---------------------------------------------------------------------------
# Pure-JAX (XLA) reference, independent of the kernel's formulation.
# ---------------------------------------------------------------------------
def lfe_reference(x, params, *, kernel_size=3, act_type="GELU"):
    n, h, w, c = x.shape
    f = params["w1"].shape[1]
    hp = jax.lax.Precision.HIGHEST

    t = jnp.einsum("nhwc,cf->nhwf", x.astype(jnp.float32), params["w1"],
                   precision=hp) + params["b1"].reshape(1, 1, 1, f)
    dw_w = params["dww"].reshape(kernel_size, kernel_size, 1, f)
    t = jax.lax.conv_general_dilated(
        t, dw_w, window_strides=(1, 1), padding="SAME",
        dimension_numbers=("NHWC", "HWIO", "NHWC"),
        feature_group_count=f, precision=hp) + params["dwb"].reshape(1, 1, 1, f)
    if act_type == "GELU":
        t = jax.nn.gelu(t, approximate=False)   # exact erf GELU == torch.nn.GELU()
    elif act_type == "ReLU":
        t = jax.nn.relu(t)
    elif act_type == "SiLU":
        t = jax.nn.silu(t)
    y = jnp.einsum("nhwf,fc->nhwc", t, params["w2"],
                   precision=hp) + params["b2"].reshape(1, 1, 1, c)
    return y.astype(x.dtype)


if __name__ == "__main__":
    key = jax.random.PRNGKey(0)
    N, H, W, DIM = 2, 16, 16, 8          # (batch, spatial, spatial, embed_dims)
    kx, kp = jax.random.split(key)
    x = jax.random.normal(kx, (N, H, W, DIM), dtype=jnp.float32)

    module = LFE(dim=DIM, kernel_size=3, act_type="GELU", ffn_drop=0.0, key=kp)
    ref = lfe_reference(x, module.params, kernel_size=3, act_type="GELU")

    # Exercise both the row-tiled (halo-recompute) path and the whole-image path.
    for rt in (8, None):
        out = jax.block_until_ready(module(x, row_tile=rt))
        assert out.shape == x.shape, (out.shape, x.shape)
        assert out.dtype == x.dtype, (out.dtype, x.dtype)
        err = float(jnp.max(jnp.abs(out - ref)))
        # Tolerance covers bf16 MXU operands (f32 accumulation) vs the f32 XLA
        # reference; observed error is far smaller in practice.
        assert jnp.allclose(out, ref, atol=5e-2, rtol=5e-2), \
            f"row_tile={rt}: max abs diff = {err}"

    print("KERNEL_OK")
</pallas_src>

<mosaic_0001>
module attributes {stable_mosaic.version = 11 : i64} {
  func.func @_lfe_kernel(%arg0: i32, %arg1: i32, %arg2: memref<1x16x16x8xf32, #tpu.memory_space<vmem>>, %arg3: memref<8x32xbf16, #tpu.memory_space<vmem>>, %arg4: memref<1x32xf32, #tpu.memory_space<vmem>>, %arg5: memref<9x32xf32, #tpu.memory_space<vmem>>, %arg6: memref<1x32xf32, #tpu.memory_space<vmem>>, %arg7: memref<32x8xbf16, #tpu.memory_space<vmem>>, %arg8: memref<1x8xf32, #tpu.memory_space<vmem>>, %arg9: memref<1x8x16x8xf32, #tpu.memory_space<vmem>>, %arg10: memref<176x32xf32, #tpu.memory_space<vmem>>) attributes {dimension_semantics = [#tpu.dimension_semantics<parallel>, #tpu.dimension_semantics<parallel>], iteration_bounds = array<i64: 2, 2>, scalar_prefetch = 0 : i64, scratch_operands = 1 : i64, tpu.core_type = #tpu.core_type<tc>, window_params = [{transform_indices = @transform_0, window_bounds = array<i64: 1, 16, 16, 8>}, {pipeline_mode = #tpu.pipeline_mode<synchronous>, transform_indices = @transform_1, window_bounds = array<i64: 8, 32>}, {pipeline_mode = #tpu.pipeline_mode<synchronous>, transform_indices = @transform_2, window_bounds = array<i64: 1, 32>}, {pipeline_mode = #tpu.pipeline_mode<synchronous>, transform_indices = @transform_3, window_bounds = array<i64: 9, 32>}, {pipeline_mode = #tpu.pipeline_mode<synchronous>, transform_indices = @transform_4, window_bounds = array<i64: 1, 32>}, {pipeline_mode = #tpu.pipeline_mode<synchronous>, transform_indices = @transform_5, window_bounds = array<i64: 32, 8>}, {pipeline_mode = #tpu.pipeline_mode<synchronous>, transform_indices = @transform_6, window_bounds = array<i64: 1, 8>}, {transform_indices = @transform_7, window_bounds = array<i64: 1, 8, 16, 8>}]} {
    %c0 = arith.constant 0 : index
    %c0_0 = arith.constant 0 : index
    %0 = vector.load %arg3[%c0, %c0_0] : memref<8x32xbf16, #tpu.memory_space<vmem>>, vector<8x32xbf16>
    %c0_1 = arith.constant 0 : index
    %c0_2 = arith.constant 0 : index
    %1 = vector.load %arg4[%c0_1, %c0_2] : memref<1x32xf32, #tpu.memory_space<vmem>>, vector<1x32xf32>
    %cst = arith.constant 0.000000e+00 : f32
    %2 = vector.broadcast %cst : f32 to vector<24x32xf32>
    %c0_3 = arith.constant 0 : index
    %c0_4 = arith.constant 0 : index
    %3 = vector.load %arg10[%c0_3, %c0_4] : memref<176x32xf32, #tpu.memory_space<vmem>>, vector<24x32xf32>
    tpu.vector_store %arg10[%c0_3, %c0_4], %2 {strides = array<i32>} : memref<176x32xf32, #tpu.memory_space<vmem>>, vector<24x32xf32>,
    %c152 = arith.constant 152 : index
    %c0_5 = arith.constant 0 : index
    %4 = vector.load %arg10[%c152, %c0_5] : memref<176x32xf32, #tpu.memory_space<vmem>>, vector<24x32xf32>
    tpu.vector_store %arg10[%c152, %c0_5], %2 {strides = array<i32>} : memref<176x32xf32, #tpu.memory_space<vmem>>, vector<24x32xf32>,
    %c8_i32 = arith.constant 8 : i32
    %5 = arith.muli %arg1, %c8_i32 : i32
    %c0_6 = arith.constant 0 : index
    %6 = arith.index_cast %5 : i32 to index
    %c0_7 = arith.constant 0 : index
    %c0_8 = arith.constant 0 : index
    %7 = vector.load %arg2[%c0_6, %6, %c0_7, %c0_8] : memref<1x16x16x8xf32, #tpu.memory_space<vmem>>, vector<1x8x16x8xf32>
    %8 = vector.shape_cast %7 : vector<1x8x16x8xf32> to vector<128x8xf32>
    %9 = arith.truncf %8 : vector<128x8xf32> to vector<128x8xbf16>
    %cst_9 = arith.constant dense<0.000000e+00> : vector<128x32xf32>
    %10 = tpu.matmul %9, %0, %cst_9 {dimension_numbers = #tpu.dot_dimension_numbers<[1], [0], [0], [1], [0, 0, 1, 1], [], []>} : vector<128x8xbf16>, vector<8x32xbf16>, vector<128x32xf32> -> vector<128x32xf32>
    %11 = vector.broadcast %1 : vector<1x32xf32> to vector<128x32xf32>
    %12 = arith.addf %10, %11 : vector<128x32xf32>
    %c24 = arith.constant 24 : index
    %c0_10 = arith.constant 0 : index
    %13 = vector.load %arg10[%c24, %c0_10] : memref<176x32xf32, #tpu.memory_space<vmem>>, vector<128x32xf32>
    tpu.vector_store %arg10[%c24, %c0_10], %12 {strides = array<i32>} : memref<176x32xf32, #tpu.memory_space<vmem>>, vector<128x32xf32>,
    %c0_i32 = arith.constant 0 : i32
    %14 = arith.cmpi sgt, %arg1, %c0_i32 : i32
    %15 = arith.extui %14 : i1 to i32
    %c0_i32_11 = arith.constant 0 : i32
    %16 = arith.cmpi ne, %15, %c0_i32_11 : i32
    scf.if %16 {
      %c8_i32_51 = arith.constant 8 : i32
      %147 = arith.muli %arg1, %c8_i32_51 : i32
      %c1_i32_52 = arith.constant 1 : i32
      %148 = arith.subi %147, %c1_i32_52 : i32
      %c0_53 = arith.constant 0 : index
      %149 = arith.index_cast %148 : i32 to index
      %c0_54 = arith.constant 0 : index
      %c0_55 = arith.constant 0 : index
      %150 = vector.load %arg2[%c0_53, %149, %c0_54, %c0_55] : memref<1x16x16x8xf32, #tpu.memory_space<vmem>>, vector<1x1x16x8xf32>
      %151 = vector.shape_cast %150 : vector<1x1x16x8xf32> to vector<16x8xf32>
      %152 = arith.truncf %151 : vector<16x8xf32> to vector<16x8xbf16>
      %cst_56 = arith.constant dense<0.000000e+00> : vector<16x32xf32>
      %153 = tpu.matmul %152, %0, %cst_56 {dimension_numbers = #tpu.dot_dimension_numbers<[1], [0], [0], [1], [0, 0, 1, 1], [], []>} : vector<16x8xbf16>, vector<8x32xbf16>, vector<16x32xf32> -> vector<16x32xf32>
      %154 = vector.broadcast %1 : vector<1x32xf32> to vector<16x32xf32>
      %155 = arith.addf %153, %154 : vector<16x32xf32>
      %c8_57 = arith.constant 8 : index
      %c0_58 = arith.constant 0 : index
      %156 = vector.load %arg10[%c8_57, %c0_58] : memref<176x32xf32, #tpu.memory_space<vmem>>, vector<16x32xf32>
      tpu.vector_store %arg10[%c8_57, %c0_58], %155 {strides = array<i32>} : memref<176x32xf32, #tpu.memory_space<vmem>>, vector<16x32xf32>,
    } else {
    }
    %c1_i32 = arith.constant 1 : i32
    %17 = arith.cmpi slt, %arg1, %c1_i32 : i32
    %18 = arith.extui %17 : i1 to i32
    %c0_i32_12 = arith.constant 0 : i32
    %19 = arith.cmpi ne, %18, %c0_i32_12 : i32
    scf.if %19 {
      %c1_i32_51 = arith.constant 1 : i32
      %147 = arith.addi %arg1, %c1_i32_51 : i32
      %c8_i32_52 = arith.constant 8 : i32
      %148 = arith.muli %147, %c8_i32_52 : i32
      %c0_53 = arith.constant 0 : index
      %149 = arith.index_cast %148 : i32 to index
      %c0_54 = arith.constant 0 : index
      %c0_55 = arith.constant 0 : index
      %150 = vector.load %arg2[%c0_53, %149, %c0_54, %c0_55] : memref<1x16x16x8xf32, #tpu.memory_space<vmem>>, vector<1x1x16x8xf32>
      %151 = vector.shape_cast %150 : vector<1x1x16x8xf32> to vector<16x8xf32>
      %152 = arith.truncf %151 : vector<16x8xf32> to vector<16x8xbf16>
      %cst_56 = arith.constant dense<0.000000e+00> : vector<16x32xf32>
      %153 = tpu.matmul %152, %0, %cst_56 {dimension_numbers = #tpu.dot_dimension_numbers<[1], [0], [0], [1], [0, 0, 1, 1], [], []>} : vector<16x8xbf16>, vector<8x32xbf16>, vector<16x32xf32> -> vector<16x32xf32>
      %154 = vector.broadcast %1 : vector<1x32xf32> to vector<16x32xf32>
      %155 = arith.addf %153, %154 : vector<16x32xf32>
      %c152_57 = arith.constant 152 : index
      %c0_58 = arith.constant 0 : index
      %156 = vector.load %arg10[%c152_57, %c0_58] : memref<176x32xf32, #tpu.memory_space<vmem>>, vector<16x32xf32>
      tpu.vector_store %arg10[%c152_57, %c0_58], %155 {strides = array<i32>} : memref<176x32xf32, #tpu.memory_space<vmem>>, vector<16x32xf32>,
    } else {
    }
    %c0_13 = arith.constant 0 : index
    %c0_14 = arith.constant 0 : index
    %20 = vector.load %arg5[%c0_13, %c0_14] : memref<9x32xf32, #tpu.memory_space<vmem>>, vector<9x32xf32>
    %21 = tpu.iota {dimensions = array<i32: 0>} : vector<160x1xi32>
    %c16_i32 = arith.constant 16 : i32
    %c0_i32_15 = arith.constant 0 : i32
    %22 = arith.cmpi eq, %c16_i32, %c0_i32_15 : i32
    %c1_i32_16 = arith.constant 1 : i32
    %23 = arith.select %22, %c1_i32_16, %c16_i32 : i32
    %24 = vector.broadcast %23 : i32 to vector<160x1xi32>
    %25 = arith.remsi %21, %24 : vector<160x1xi32>
    %c0_i32_17 = arith.constant 0 : i32
    %26 = vector.broadcast %c0_i32_17 : i32 to vector<160x1xi32>
    %27 = arith.cmpi ne, %25, %26 : vector<160x1xi32>
    %c0_i32_18 = arith.constant 0 : i32
    %28 = vector.broadcast %c0_i32_18 : i32 to vector<160x1xi32>
    %29 = arith.cmpi slt, %25, %28 : vector<160x1xi32>
    %c0_i32_19 = arith.constant 0 : i32
    %30 = arith.cmpi slt, %23, %c0_i32_19 : i32
    %31 = vector.broadcast %30 : i1 to vector<160x1xi1>
    %32 = vector.broadcast %31 : vector<160x1xi1> to vector<160x1xi1>
    %33 = arith.xori %29, %32 : vector<160x1xi1>
    %34 = arith.andi %33, %27 : vector<160x1xi1>
    %35 = vector.broadcast %23 : i32 to vector<160x1xi32>
    %36 = arith.addi %25, %35 : vector<160x1xi32>
    %37 = arith.select %34, %36, %25 : vector<160x1xi1>, vector<160x1xi32>
    %c7 = arith.constant 7 : index
    %c0_20 = arith.constant 0 : index
    %38 = vector.load %arg10[%c7, %c0_20] : memref<176x32xf32, #tpu.memory_space<vmem>>, vector<160x32xf32>
    %c1_i32_21 = arith.constant 1 : i32
    %39 = vector.broadcast %c1_i32_21 : i32 to vector<160x1xi32>
    %40 = arith.cmpi sge, %37, %39 : vector<160x1xi32>
    %cst_22 = arith.constant 0.000000e+00 : f32
    %41 = vector.shape_cast %40 : vector<160x1xi1> to vector<160x1xi1>
    %42 = vector.broadcast %41 : vector<160x1xi1> to vector<160x32xi1>
    %43 = vector.broadcast %cst_22 : f32 to vector<160x32xf32>
    %44 = arith.select %42, %38, %43 : vector<160x32xi1>, vector<160x32xf32>
    %45 = vector.extract_strided_slice %44 {offsets = [0, 0], sizes = [128, 32], strides = [1, 1]} : vector<160x32xf32> to vector<128x32xf32>
    %46 = vector.extract_strided_slice %20 {offsets = [0, 0], sizes = [1, 32], strides = [1, 1]} : vector<9x32xf32> to vector<1x32xf32>
    %47 = vector.broadcast %46 : vector<1x32xf32> to vector<128x32xf32>
    %48 = arith.mulf %45, %47 : vector<128x32xf32>
    %49 = vector.extract_strided_slice %44 {offsets = [16, 0], sizes = [128, 32], strides = [1, 1]} : vector<160x32xf32> to vector<128x32xf32>
    %50 = vector.extract_strided_slice %20 {offsets = [3, 0], sizes = [1, 32], strides = [1, 1]} : vector<9x32xf32> to vector<1x32xf32>
    %51 = vector.broadcast %50 : vector<1x32xf32> to vector<128x32xf32>
    %52 = arith.mulf %49, %51 : vector<128x32xf32>
    %53 = arith.addf %48, %52 : vector<128x32xf32>
    %54 = vector.extract_strided_slice %44 {offsets = [32, 0], sizes = [128, 32], strides = [1, 1]} : vector<160x32xf32> to vector<128x32xf32>
    %55 = vector.extract_strided_slice %20 {offsets = [6, 0], sizes = [1, 32], strides = [1, 1]} : vector<9x32xf32> to vector<1x32xf32>
    %56 = vector.broadcast %55 : vector<1x32xf32> to vector<128x32xf32>
    %57 = arith.mulf %54, %56 : vector<128x32xf32>
    %58 = arith.addf %53, %57 : vector<128x32xf32>
    %c8 = arith.constant 8 : index
    %c0_23 = arith.constant 0 : index
    %59 = vector.load %arg10[%c8, %c0_23] : memref<176x32xf32, #tpu.memory_space<vmem>>, vector<160x32xf32>
    %60 = vector.extract_strided_slice %59 {offsets = [0, 0], sizes = [128, 32], strides = [1, 1]} : vector<160x32xf32> to vector<128x32xf32>
    %61 = vector.extract_strided_slice %20 {offsets = [1, 0], sizes = [1, 32], strides = [1, 1]} : vector<9x32xf32> to vector<1x32xf32>
    %62 = vector.broadcast %61 : vector<1x32xf32> to vector<128x32xf32>
    %63 = arith.mulf %60, %62 : vector<128x32xf32>
    %64 = arith.addf %58, %63 : vector<128x32xf32>
    %65 = vector.extract_strided_slice %59 {offsets = [16, 0], sizes = [128, 32], strides = [1, 1]} : vector<160x32xf32> to vector<128x32xf32>
    %66 = vector.extract_strided_slice %20 {offsets = [4, 0], sizes = [1, 32], strides = [1, 1]} : vector<9x32xf32> to vector<1x32xf32>
    %67 = vector.broadcast %66 : vector<1x32xf32> to vector<128x32xf32>
    %68 = arith.mulf %65, %67 : vector<128x32xf32>
    %69 = arith.addf %64, %68 : vector<128x32xf32>
    %70 = vector.extract_strided_slice %59 {offsets = [32, 0], sizes = [128, 32], strides = [1, 1]} : vector<160x32xf32> to vector<128x32xf32>
    %71 = vector.extract_strided_slice %20 {offsets = [7, 0], sizes = [1, 32], strides = [1, 1]} : vector<9x32xf32> to vector<1x32xf32>
    %72 = vector.broadcast %71 : vector<1x32xf32> to vector<128x32xf32>
    %73 = arith.mulf %70, %72 : vector<128x32xf32>
    %74 = arith.addf %69, %73 : vector<128x32xf32>
    %c9 = arith.constant 9 : index
    %c0_24 = arith.constant 0 : index
    %75 = vector.load %arg10[%c9, %c0_24] : memref<176x32xf32, #tpu.memory_space<vmem>>, vector<160x32xf32>
    %c15_i32 = arith.constant 15 : i32
    %76 = vector.broadcast %c15_i32 : i32 to vector<160x1xi32>
    %77 = arith.cmpi slt, %37, %76 : vector<160x1xi32>
    %cst_25 = arith.constant 0.000000e+00 : f32
    %78 = vector.shape_cast %77 : vector<160x1xi1> to vector<160x1xi1>
    %79 = vector.broadcast %78 : vector<160x1xi1> to vector<160x32xi1>
    %80 = vector.broadcast %cst_25 : f32 to vector<160x32xf32>
    %81 = arith.select %79, %75, %80 : vector<160x32xi1>, vector<160x32xf32>
    %82 = vector.extract_strided_slice %81 {offsets = [0, 0], sizes = [128, 32], strides = [1, 1]} : vector<160x32xf32> to vector<128x32xf32>
    %83 = vector.extract_strided_slice %20 {offsets = [2, 0], sizes = [1, 32], strides = [1, 1]} : vector<9x32xf32> to vector<1x32xf32>
    %84 = vector.broadcast %83 : vector<1x32xf32> to vector<128x32xf32>
    %85 = arith.mulf %82, %84 : vector<128x32xf32>
    %86 = arith.addf %74, %85 : vector<128x32xf32>
    %87 = vector.extract_strided_slice %81 {offsets = [16, 0], sizes = [128, 32], strides = [1, 1]} : vector<160x32xf32> to vector<128x32xf32>
    %88 = vector.extract_strided_slice %20 {offsets = [5, 0], sizes = [1, 32], strides = [1, 1]} : vector<9x32xf32> to vector<1x32xf32>
    %89 = vector.broadcast %88 : vector<1x32xf32> to vector<128x32xf32>
    %90 = arith.mulf %87, %89 : vector<128x32xf32>
    %91 = arith.addf %86, %90 : vector<128x32xf32>
    %92 = vector.extract_strided_slice %81 {offsets = [32, 0], sizes = [128, 32], strides = [1, 1]} : vector<160x32xf32> to vector<128x32xf32>
    %93 = vector.extract_strided_slice %20 {offsets = [8, 0], sizes = [1, 32], strides = [1, 1]} : vector<9x32xf32> to vector<1x32xf32>
    %94 = vector.broadcast %93 : vector<1x32xf32> to vector<128x32xf32>
    %95 = arith.mulf %92, %94 : vector<128x32xf32>
    %96 = arith.addf %91, %95 : vector<128x32xf32>
    %c0_26 = arith.constant 0 : index
    %c0_27 = arith.constant 0 : index
    %97 = vector.load %arg6[%c0_26, %c0_27] : memref<1x32xf32, #tpu.memory_space<vmem>>, vector<1x32xf32>
    %98 = vector.broadcast %97 : vector<1x32xf32> to vector<128x32xf32>
    %99 = arith.addf %96, %98 : vector<128x32xf32>
    %cst_28 = arith.constant 5.000000e-01 : f32
    %100 = vector.broadcast %cst_28 : f32 to vector<128x32xf32>
    %101 = arith.mulf %100, %99 : vector<128x32xf32>
    %cst_29 = arith.constant 0.707106769 : f32
    %102 = vector.broadcast %cst_29 : f32 to vector<128x32xf32>
    %103 = arith.mulf %99, %102 : vector<128x32xf32>
    %104 = math.absf %103 : vector<128x32xf32>
    %cst_30 = arith.constant 0.327591091 : f32
    %105 = vector.broadcast %cst_30 : f32 to vector<128x32xf32>
    %106 = arith.mulf %105, %104 : vector<128x32xf32>
    %cst_31 = arith.constant 1.000000e+00 : f32
    %107 = vector.broadcast %cst_31 : f32 to vector<128x32xf32>
    %108 = arith.addf %107, %106 : vector<128x32xf32>
    %109 = tpu.reciprocal %108 {approx = true} : vector<128x32xf32> -> vector<128x32xf32>
    %cst_32 = arith.constant 1.06140542 : f32
    %110 = vector.broadcast %cst_32 : f32 to vector<128x32xf32>
    %111 = arith.mulf %110, %109 : vector<128x32xf32>
    %cst_33 = arith.constant -1.45315206 : f32
    %112 = vector.broadcast %cst_33 : f32 to vector<128x32xf32>
    %113 = arith.addf %111, %112 : vector<128x32xf32>
    %114 = arith.mulf %113, %109 : vector<128x32xf32>
    %cst_34 = arith.constant 1.42141378 : f32
    %115 = vector.broadcast %cst_34 : f32 to vector<128x32xf32>
    %116 = arith.addf %114, %115 : vector<128x32xf32>
    %117 = arith.mulf %116, %109 : vector<128x32xf32>
    %cst_35 = arith.constant -0.284496725 : f32
    %118 = vector.broadcast %cst_35 : f32 to vector<128x32xf32>
    %119 = arith.addf %117, %118 : vector<128x32xf32>
    %120 = arith.mulf %119, %109 : vector<128x32xf32>
    %cst_36 = arith.constant 0.254829586 : f32
    %121 = vector.broadcast %cst_36 : f32 to vector<128x32xf32>
    %122 = arith.addf %120, %121 : vector<128x32xf32>
    %123 = arith.mulf %122, %109 : vector<128x32xf32>
    %cst_37 = arith.constant 0.000000e+00 : f32
    %124 = vector.broadcast %cst_37 : f32 to vector<128x32xf32>
    %125 = arith.subf %124, %104 : vector<128x32xf32>
    %126 = arith.mulf %125, %104 : vector<128x32xf32>
    %127 = math.exp %126 : vector<128x32xf32>
    %128 = arith.mulf %123, %127 : vector<128x32xf32>
    %cst_38 = arith.constant 1.000000e+00 : f32
    %129 = vector.broadcast %cst_38 : f32 to vector<128x32xf32>
    %130 = arith.subf %129, %128 : vector<128x32xf32>
    %cst_39 = arith.constant 0.000000e+00 : f32
    %131 = vector.broadcast %cst_39 : f32 to vector<128x32xf32>
    %132 = arith.cmpf oge, %103, %131 : vector<128x32xf32>
    %cst_40 = arith.constant 0.000000e+00 : f32
    %133 = vector.broadcast %cst_40 : f32 to vector<128x32xf32>
    %134 = arith.subf %133, %130 : vector<128x32xf32>
    %135 = arith.select %132, %130, %134 : vector<128x32xi1>, vector<128x32xf32>
    %cst_41 = arith.constant 1.000000e+00 : f32
    %136 = vector.broadcast %cst_41 : f32 to vector<128x32xf32>
    %137 = arith.addf %136, %135 : vector<128x32xf32>
    %138 = arith.mulf %101, %137 : vector<128x32xf32>
    %139 = arith.truncf %138 : vector<128x32xf32> to vector<128x32xbf16>
    %c0_42 = arith.constant 0 : index
    %c0_43 = arith.constant 0 : index
    %140 = vector.load %arg7[%c0_42, %c0_43] : memref<32x8xbf16, #tpu.memory_space<vmem>>, vector<32x8xbf16>
    %cst_44 = arith.constant dense<0.000000e+00> : vector<128x8xf32>
    %141 = tpu.matmul %139, %140, %cst_44 {dimension_numbers = #tpu.dot_dimension_numbers<[1], [0], [0], [1], [0, 0, 1, 1], [], []>} : vector<128x32xbf16>, vector<32x8xbf16>, vector<128x8xf32> -> vector<128x8xf32>
    %c0_45 = arith.constant 0 : index
    %c0_46 = arith.constant 0 : index
    %142 = vector.load %arg8[%c0_45, %c0_46] : memref<1x8xf32, #tpu.memory_space<vmem>>, vector<1x8xf32>
    %143 = vector.broadcast %142 : vector<1x8xf32> to vector<128x8xf32>
    %144 = arith.addf %141, %143 : vector<128x8xf32>
    %145 = vector.shape_cast %144 : vector<128x8xf32> to vector<1x8x16x8xf32>
    %c0_47 = arith.constant 0 : index
    %c0_48 = arith.constant 0 : index
    %c0_49 = arith.constant 0 : index
    %c0_50 = arith.constant 0 : index
    %146 = vector.load %arg9[%c0_47, %c0_48, %c0_49, %c0_50] : memref<1x8x16x8xf32, #tpu.memory_space<vmem>>, vector<1x8x16x8xf32>
    tpu.vector_store %arg9[%c0_47, %c0_48, %c0_49, %c0_50], %145 {strides = array<i32>} : memref<1x8x16x8xf32, #tpu.memory_space<vmem>>, vector<1x8x16x8xf32>,
    return
  }
  func.func @transform_0(%arg0: i32, %arg1: i32) -> (i32, i32, i32, i32) {
    %c0_i32 = arith.constant 0 : i32
    %c0_i32_0 = arith.constant 0 : i32
    %c0_i32_1 = arith.constant 0 : i32
    %c0_i32_2 = arith.constant 0 : i32
    return %arg0, %c0_i32, %c0_i32_0, %c0_i32_1 : i32, i32, i32, i32
  }
  func.func @transform_1(%arg0: i32, %arg1: i32) -> (i32, i32) {
    %c0_i32 = arith.constant 0 : i32
    %c0_i32_0 = arith.constant 0 : i32
    %c0_i32_1 = arith.constant 0 : i32
    return %c0_i32, %c0_i32_0 : i32, i32
  }
  func.func @transform_2(%arg0: i32, %arg1: i32) -> (i32, i32) {
    %c0_i32 = arith.constant 0 : i32
    %c0_i32_0 = arith.constant 0 : i32
    %c0_i32_1 = arith.constant 0 : i32
    return %c0_i32, %c0_i32_0 : i32, i32
  }
  func.func @transform_3(%arg0: i32, %arg1: i32) -> (i32, i32) {
    %c0_i32 = arith.constant 0 : i32
    %c0_i32_0 = arith.constant 0 : i32
    %c0_i32_1 = arith.constant 0 : i32
    return %c0_i32, %c0_i32_0 : i32, i32
  }
  func.func @transform_4(%arg0: i32, %arg1: i32) -> (i32, i32) {
    %c0_i32 = arith.constant 0 : i32
    %c0_i32_0 = arith.constant 0 : i32
    %c0_i32_1 = arith.constant 0 : i32
    return %c0_i32, %c0_i32_0 : i32, i32
  }
  func.func @transform_5(%arg0: i32, %arg1: i32) -> (i32, i32) {
    %c0_i32 = arith.constant 0 : i32
    %c0_i32_0 = arith.constant 0 : i32
    %c0_i32_1 = arith.constant 0 : i32
    return %c0_i32, %c0_i32_0 : i32, i32
  }
  func.func @transform_6(%arg0: i32, %arg1: i32) -> (i32, i32) {
    %c0_i32 = arith.constant 0 : i32
    %c0_i32_0 = arith.constant 0 : i32
    %c0_i32_1 = arith.constant 0 : i32
    return %c0_i32, %c0_i32_0 : i32, i32
  }
  func.func @transform_7(%arg0: i32, %arg1: i32) -> (i32, i32, i32, i32) {
    %c0_i32 = arith.constant 0 : i32
    %c0_i32_0 = arith.constant 0 : i32
    %c0_i32_1 = arith.constant 0 : i32
    return %arg0, %arg1, %c0_i32, %c0_i32_0 : i32, i32, i32, i32
  }
}

</mosaic_0001>

<bundles_post_ra>
// kernel: tpu_custom_call.1
= control target key start
LH: loop header
LB: loop body
LE: loop exit
PB: predicated region body
PF: predicated region fallthrough
CT: control target
= control target key end

     0   :  { %s2424_s24 = smov 0   ;;  %s2426_s25 = smov 0   ;;  %s3410_s0 = inlined_call_operand.vmem [shape: f32[2,16,16,8], index: 0, kind: input, shape index: {}]   ;;  %s3411_s1 = inlined_call_operand.vmem [shape: bf16[8,32], index: 1, kind: input, shape index: {}]   ;;  %s3412_s2 = inlined_call_operand.vmem [shape: f32[1,32], index: 2, kind: input, shape index: {}]   ;;  %s3413_s3 = inlined_call_operand.vmem [shape: f32[9,32], index: 3, kind: input, shape index: {}]   ;;  %s3414_s4 = inlined_call_operand.vmem [shape: f32[1,32], index: 4, kind: input, shape index: {}]   ;;  %s3415_s5 = inlined_call_operand.vmem [shape: bf16[32,8], index: 5, kind: input, shape index: {}]   ;;  %s3416_s6 = inlined_call_operand.vmem [shape: f32[1,8], index: 6, kind: input, shape index: {}]   ;;  %s3417_s7 = inlined_call_operand.vmem [shape: f32[2,16,16,8], index: 7, kind: output, shape index: {}]  }
   0x1   :  { %s2428_s26 = smov 0   ;;  %s2430_s27 = smov 0  }
   0x2   :  { %s2432_s28 = smov 0  }
   0x3 LB: > { %s26_s29 = sadd.s32 1, %s2369_s26  ;;  %s29_s30 = sadd.s32 1, %s2373_s27  ;;  %s2377_s28 = sphi %s2432_s28, %s17_s28   ;;  %s2373_s27 = sphi %s2430_s27, %s3511_s27   ;;  %s2369_s26 = sphi %s2428_s26, %s3510_s26   ;;  %s2365_s25 = sphi %s2426_s25, %s3509_s25   ;;  %s2361_s24 = sphi %s2424_s24, %s3508_s24  }
   0x4   : > { %p27_p0 = scmp.ge.s32.totalorder %s26_s29, 2  ;;  %p2101_p1 = scmp.ge.s32.totalorder %s2377_s28, 1 }
   0x5   : > { %p251_p2 = scmp.lt.s32.totalorder %s2377_s28, 5 }
   0x6   : > { %s3513_s29 = smov (%p27_p0, %s26_s29), 0  ;;  %s3515_s30 = smov (!%p27_p0, %s29_s30), %s2373_s27 }
   0x7   : > { %p252_p3 = pnand %p2101_p1, %p251_p2  ;;  %p31_p4 = scmp.ge.s32.totalorder %s3515_s30, 2 }
   0x9   : > { %s3517_s30 = smov (%p31_p4, %s3515_s30), 0  ;;  %255 = sbr.rel (%p252_p3) target bundleno = 1092 (0x444), region = 48 }
   0xe   : > { %v305_v0 = vld [vmem:[%s3411_s1] sm:$0xf]  ;;  %vm372_vm0 = vcmask 1043456   ;;  %p288_p5 = scmp.lt.s32.totalorder %s2365_s25, 1  ;;  %s2460_s10 = sshll.u32 %s2361_s24, 3  ;;  %vm307_vm1 = vcmask 261120  }
   0xf   : > { %2224 = vmatprep.subr.msk.bf16.mxu0 %vm372_vm0, %v305_v0  ;;  %2225 = vmatprep.subr.msk.bf16.mxu1 %vm372_vm0, %v305_v0  ;;  %v2462_v1 = vsel %vm372_vm0, %v305_v0, 0  ;;  %p296_p6 = scmp.lt.s32.totalorder %s2460_s10, 15  ;;  %s2144_s11 = sshll.u32 %s2361_s24, 7  ;;  %v2379_v2 = vmov 0.0   ;;  %vm347_vm2 = vcmask 64512  }
  0x10   : > { %2169 = vmatpush3.bf16.msra.mxu0 %v2462_v1  ;;  %2219 = vmatpush3.bf16.msra.mxu1 %v2462_v1  ;;  %s3519_s25 = smov (!%p288_p5, %s2365_s25), 1  ;;  %308 = vst.msk [vmem:[#allocation2] sm:$0xff] %vm307_vm1, %v2379_v2  ;;  %309 = vst.msk [vmem:[#allocation2 + $0x8] sm:$0xff] %vm307_vm1, %v2379_v2  ;;  %v2515_v27 = vld [vmem:[%s3412_s2] ss:$0 sm:$0xff]  ;;  %p2119_p7 = scmp.le.s32.totalorder %s2361_s24, 0 }
  0x11   : > { %310 = vst.msk [vmem:[#allocation2 + $0x10] sm:$0xff] %vm307_vm1, %v2379_v2  ;;  %311 = vst.msk [vmem:[#allocation2 + $0x98] sm:$0xff] %vm307_vm1, %v2379_v2  ;;  %s297_s12 = scalar_select %p296_p6, %s2460_s10, 15 }
  0x12   : > { %312 = vst.msk [vmem:[#allocation2 + $0xa0] sm:$0xff] %vm307_vm1, %v2379_v2  ;;  %313 = vst.msk [vmem:[#allocation2 + $0xa8] sm:$0xff] %vm307_vm1, %v2379_v2  ;;  %s2143_s13 = sshll.u32 %s3519_s25, 8  ;;  %s2106_s14 = sshll.u32 %s3519_s25, 5 }
  0x13   : > { %s2478_s17 = scalar_lea.vmem %s3410_s0, %s2143_s13  ;;  %s2105_s18 = sshll.u32 %s297_s12, 1 }
  0x14   : > { %s300_s19 = sadd.s32 %s2106_s14, %s2105_s18  ;;  %s2481_s20 = scalar_lea.vmem %s2478_s17, %s2144_s11 }
  0x15   : > { %s2107_s21 = sshll.u32 %s300_s19, 3  ;;  %v317_v3 = vld [vmem:[%s2481_s20] sm:$0xff]  ;;  %v318_v4 = vld [vmem:[%s2481_s20 + $0x8] sm:$0xff]  ;;  %v319_v8 = vld [vmem:[%s2481_s20 + $0x10] sm:$0xff]  ;;  %s2120_s11 = sadd.s32 (!%p2119_p7), 4294967295, %s2460_s10 }
  0x16   : > { %v325_v5 = vld [vmem:[%s2481_s20 + $0x40] sm:$0xff]  ;;  %s2489_s25 = scalar_lea.vmem %s3417_s7, %s2107_s21  ;;  %v333_v6 = vpack.c.bf16 %v318_v4, %v317_v3  ;;  %v326_v7 = vld [vmem:[%s2481_s20 + $0x48] sm:$0xff]  ;;  %v320_v9 = vld [vmem:[%s2481_s20 + $0x18] sm:$0xff]  ;;  %s2121_s12 = sshll.u32 (!%p2119_p7), %s2120_s11, 4 }
  0x17   : > { %v337_v10 = vpack.c.bf16 %v326_v7, %v325_v5  ;;  %v334_v11 = vpack.c.bf16 %v320_v9, %v319_v8  ;;  %v327_v12 = vld [vmem:[%s2481_s20 + $0x50] sm:$0xff]  ;;  %v328_v13 = vld [vmem:[%s2481_s20 + $0x58] sm:$0xff]  ;;  %v321_v14 = vld [vmem:[%s2481_s20 + $0x20] sm:$0xff]  ;;  %s495_s13 = scalar_lea.vmem (!%p2119_p7), %s2478_s17, %s2121_s12 }
  0x18   : > { %2170 = vmatprep.mubr.msk.bf16.mxu0 %vm347_vm2, %v333_v6  ;;  %v338_v15 = vpack.c.bf16 %v328_v13, %v327_v12  ;;  %v322_v16 = vld [vmem:[%s2481_s20 + $0x28] sm:$0xff]  ;;  %v329_v17 = vld [vmem:[%s2481_s20 + $0x60] sm:$0xff]  ;;  %v323_v21 = vld [vmem:[%s2481_s20 + $0x30] sm:$0xff] }
  0x19   : > { %v330_v18 = vld [vmem:[%s2481_s20 + $0x68] sm:$0xff]  ;;  %2178 = vmatprep.mubr.msk.bf16.mxu1 %vm347_vm2, %v337_v10  ;;  %2171 = vmatmul.mubr.msk.bf16.vlgmr.msra.gmra.mxu0 %vm347_vm2, %v334_v11  ;;  %v335_v19 = vpack.c.bf16 %v322_v16, %v321_v14  ;;  %v324_v22 = vld [vmem:[%s2481_s20 + $0x38] sm:$0xff]  ;;  %v331_v23 = vld [vmem:[%s2481_s20 + $0x70] sm:$0xff] }
  0x1a   : > { %v339_v20 = vpack.c.bf16 %v330_v18, %v329_v17  ;;  %2179 = vmatmul.mubr.msk.bf16.vlgmr.msra.gmra.mxu1 %vm347_vm2, %v338_v15  ;;  %v332_v24 = vld [vmem:[%s2481_s20 + $0x78] sm:$0xff]  ;;  %v336_v25 = vpack.c.bf16 %v324_v22, %v323_v21 }
  0x1b   : > { %2174 = vmatprep.mubr.msk.bf16.mxu0 %vm347_vm2, %v335_v19  ;;  %v340_v26 = vpack.c.bf16 %v332_v24, %v331_v23 }
  0x1c   : > { %2182 = vmatprep.mubr.msk.bf16.mxu1 %vm347_vm2, %v339_v20 }
  0x21   : > { %2175 = vmatmul.mubr.msk.bf16.gmra.mxu0 %vm347_vm2, %v336_v25 }
  0x22   : > { %2183 = vmatmul.mubr.msk.bf16.gmra.mxu1 %vm347_vm2, %v340_v26 }
  0xd9   : > { %v2172_v28 = vpop.f32.mrf.mxu0 }
  0xda   : > { %v419_v29 = vadd.f32 %v2172_v28, %v2515_v27  ;;  %v2180_v30 = vpop.f32.mrf.mxu1 }
  0xdb   : > { %v451_v31 = vadd.f32 %v2180_v30, %v2515_v27  ;;  %v410_v32 = vpop.f32.mrf.mxu0 }
  0xdc   : > { %475 = vst.msk [vmem:[#allocation2 + $0x28] sm:$0xff] %vm307_vm1, %v419_v29  ;;  %v411_v33 = vadd.f32 %v2515_v27, %v410_v32  ;;  %v442_v34 = vpop.f32.mrf.mxu1 }
  0xdd   : > { %483 = vst.msk [vmem:[#allocation2 + $0x68] sm:$0xff] %vm307_vm1, %v451_v31  ;;  %v443_v35 = vadd.f32 %v2515_v27, %v442_v34  ;;  %v2173_v36 = vpop.f32.mrf.mxu0 }
  0xde   : > { %473 = vst.msk [vmem:[#allocation2 + $0x18] sm:$0xff] %vm307_vm1, %v411_v33  ;;  %v422_v37 = vadd.f32 %v2173_v36, %v2515_v27  ;;  %v2181_v38 = vpop.f32.mrf.mxu1 }
  0xdf   : > { %481 = vst.msk [vmem:[#allocation2 + $0x58] sm:$0xff] %vm307_vm1, %v443_v35  ;;  %v454_v39 = vadd.f32 %v2181_v38, %v2515_v27  ;;  %v413_v40 = vpop.f32.mrf.mxu0 }
  0xe0   : > { %476 = vst.msk [vmem:[#allocation2 + $0x30] sm:$0xff] %vm307_vm1, %v422_v37  ;;  %v414_v41 = vadd.f32 %v2515_v27, %v413_v40  ;;  %v445_v42 = vpop.f32.mrf.mxu1 }
  0xe1   : > { %484 = vst.msk [vmem:[#allocation2 + $0x70] sm:$0xff] %vm307_vm1, %v454_v39  ;;  %v446_v43 = vadd.f32 %v2515_v27, %v445_v42  ;;  %v2176_v44 = vpop.f32.mrf.mxu0 }
  0xe2   : > { %474 = vst.msk [vmem:[#allocation2 + $0x20] sm:$0xff] %vm307_vm1, %v414_v41  ;;  %v435_v45 = vadd.f32 %v2176_v44, %v2515_v27  ;;  %v2184_v46 = vpop.f32.mrf.mxu1 }
  0xe3   : > { %482 = vst.msk [vmem:[#allocation2 + $0x60] sm:$0xff] %vm307_vm1, %v446_v43  ;;  %v467_v47 = vadd.f32 %v2184_v46, %v2515_v27  ;;  %v426_v48 = vpop.f32.mrf.mxu0 }
  0xe4   : > { %479 = vst.msk [vmem:[#allocation2 + $0x48] sm:$0xff] %vm307_vm1, %v435_v45  ;;  %v427_v49 = vadd.f32 %v2515_v27, %v426_v48  ;;  %v458_v50 = vpop.f32.mrf.mxu1 }
  0xe5   : > { %487 = vst.msk [vmem:[#allocation2 + $0x88] sm:$0xff] %vm307_vm1, %v467_v47  ;;  %v459_v51 = vadd.f32 %v2515_v27, %v458_v50  ;;  %v2177_v52 = vpop.f32.mrf.mxu0 }
  0xe6   : > { %477 = vst.msk [vmem:[#allocation2 + $0x38] sm:$0xff] %vm307_vm1, %v427_v49  ;;  %v438_v53 = vadd.f32 %v2177_v52, %v2515_v27  ;;  %v2185_v54 = vpop.f32.mrf.mxu1 }
  0xe7   : > { %485 = vst.msk [vmem:[#allocation2 + $0x78] sm:$0xff] %vm307_vm1, %v459_v51  ;;  %v470_v55 = vadd.f32 %v2185_v54, %v2515_v27  ;;  %v429_v56 = vpop.f32.mrf.mxu0  ;;  %492 = sbr.rel (%p2119_p7) target bundleno = 441 (0x1b9), region = 52 }
  0xe8   : > { %480 = vst.msk [vmem:[#allocation2 + $0x50] sm:$0xff] %vm307_vm1, %v438_v53  ;;  %v430_v57 = vadd.f32 %v2515_v27, %v429_v56  ;;  %v461_v58 = vpop.f32.mrf.mxu1 }
  0xe9   : > { %488 = vst.msk [vmem:[#allocation2 + $0x90] sm:$0xff] %vm307_vm1, %v470_v55  ;;  %v462_v59 = vadd.f32 %v2515_v27, %v461_v58 }
  0xea   : > { %478 = vst.msk [vmem:[#allocation2 + $0x40] sm:$0xff] %vm307_vm1, %v430_v57 }
  0xeb   : > { %486 = vst.msk [vmem:[#allocation2 + $0x80] sm:$0xff] %vm307_vm1, %v462_v59 }
  0xec   : > { %v2380_v60 = vmov 0.0   ;;  %vm2381_vm3 = vmmov 0   ;;  %v496_v61 = vld [vmem:[%s495_s13] sm:$0xff]  ;;  %v497_v62 = vld [vmem:[%s495_s13 + $0x8] sm:$0xff] }
  0xed   : > { %2186 = vmatprep.subr.bf16.mxu0 %v2380_v60  ;;  %2188 = vmatprep.mubr.msk.bf16.mxu0 %vm2381_vm3, %v2380_v60  ;;  %v498_v63 = vpack.c.bf16 %v497_v62, %v496_v61 }
  0xee   : > { %2187 = vmatpush3.bf16.msra.mxu0 %v2462_v1 }
  0xf1   : > { %2189 = vmatmul.mubr.msk.bf16.vlgmr.msra.gmra.mxu0 %vm347_vm2, %v498_v63 }
 0x1b1   : > { %v536_v0 = vpop.f32.mrf.mxu0 }
 0x1b2   : > { %v537_v2 = vadd.f32 %v2515_v27, %v536_v0 }
 0x1b3   : > { %v2190_v3 = vpop.f32.mrf.mxu0 }
 0x1b4   : > { %543 = vst.msk [vmem:[#allocation2 + $0x8] sm:$0xff] %vm307_vm1, %v537_v2 }
 0x1b5   : > { %v539_v4 = vpop.f32.mrf.mxu0 }
 0x1b6   : > { %v540_v5 = vadd.f32 %v2515_v27, %v539_v4 }
 0x1b7   : > { %v2191_v6 = vpop.f32.mrf.mxu0 }
 0x1b8   : > { %544 = vst.msk [vmem:[#allocation2 + $0x10] sm:$0xff] %vm307_vm1, %v540_v5 }
 0x1b9 PF: > { %p2123_p8 = scmp.ge.s32.totalorder %s2361_s24, 1 }
 0x1bb   : > { %548 = sbr.rel (%p2123_p8) target bundleno = 653 (0x28d), region = 56 }
 0x1c0   : > { %v2125_v7 = vld [vmem:[%s2481_s20 + $0x80] sm:$0xff]  ;;  %v2126_v8 = vld [vmem:[%s2481_s20 + $0x88] sm:$0xff]  ;;  %v2382_v9 = vmov 0.0   ;;  %vm2383_vm4 = vmmov 0  }
 0x1c1   : > { %2192 = vmatprep.subr.bf16.mxu0 %v2382_v9  ;;  %2194 = vmatprep.mubr.msk.bf16.mxu0 %vm2383_vm4, %v2382_v9  ;;  %v555_v10 = vpack.c.bf16 %v2126_v8, %v2125_v7 }
 0x1c2   : > { %2193 = vmatpush3.bf16.msra.mxu0 %v2462_v1 }
 0x1c5   : > { %2195 = vmatmul.mubr.msk.bf16.vlgmr.msra.gmra.mxu0 %vm347_vm2, %v555_v10 }
 0x285   : > { %v593_v11 = vpop.f32.mrf.mxu0 }
 0x286   : > { %v594_v12 = vadd.f32 %v2515_v27, %v593_v11 }
 0x287   : > { %v2196_v13 = vpop.f32.mrf.mxu0 }
 0x288   : > { %600 = vst.msk [vmem:[#allocation2 + $0x98] sm:$0xff] %vm307_vm1, %v594_v12 }
 0x289   : > { %v596_v14 = vpop.f32.mrf.mxu0 }
 0x28a   : > { %v597_v15 = vadd.f32 %v2515_v27, %v596_v14 }
 0x28b   : > { %v2197_v16 = vpop.f32.mrf.mxu0 }
 0x28c   : > { %601 = vst.msk [vmem:[#allocation2 + $0xa0] sm:$0xff] %vm307_vm1, %v597_v15 }
 0x28d PF: > { %v2271_v17 = vld [vmem:[%s3415_s5 + $0x8] sm:$0xff]   ;;  %v604_v1 = vlaneseq  ;;  %v2272_v18 = vld [vmem:[%s3415_s5] sm:$0xff]   ;;  %v867_v30 = vld [vmem:[#allocation2 + $0x17] sm:$0xff] }
 0x28e   : > { %2198 = vmatprep.subr.bf16.mxu0 %v2271_v17  ;;  %2220 = vmatprep.subr.bf16.mxu1 %v2271_v17  ;;  %v2578_v20 = vld [vmem:[%s3413_s3] sm:$0xff]  ;;  %v866_v29 = vld [vmem:[#allocation2 + $0xf] sm:$0xff]  ;;  %v1059_v62 = vld [vmem:[#allocation2 + $0x18] sm:$0xff] }
 0x28f   : > { %v2573_v19 = vshrl.u32 %v604_v1, 7  ;;  %2199 = vmatpush3.bf16.msra.mxu0 %v2271_v17  ;;  %2222 = vmatpush3.bf16.msra.mxu1 %v2271_v17  ;;  %v865_v24 = vld [vmem:[#allocation2 + $0x7] sm:$0xff]  ;;  %v868_v33 = vld [vmem:[#allocation2 + $0x1f] sm:$0xff]  ;;  %v2597_v43 = vld [vmem:[#allocation2 + $0x2f] sm:$0xff] }
 0x290   : > { %2200 = vmatprep.subr.bf16.mxu0 %v2272_v18  ;;  %2221 = vmatprep.subr.bf16.mxu1 %v2272_v18  ;;  %v869_v34 = vld [vmem:[#allocation2 + $0x27] sm:$0xff]  ;;  %v1058_v55 = vld [vmem:[#allocation2 + $0x10] sm:$0xff] }
 0x291   : > { %v607_v21 = vadd.s32 16, %v2573_v19  ;;  %v609_v22 = vadd.s32 32, %v2573_v19  ;;  %v629_v23 = vand.u32 15, %v2573_v19  ;;  %v967_v25 = vsub.s32 0, %v2573_v19  ;;  %v1057_v54 = vld [vmem:[#allocation2 + $0x8] sm:$0xff]  ;;  %v1060_v63 = vld [vmem:[#allocation2 + $0x20] sm:$0xff] }
 0x292   : > { %v987_v26 = vsub.s32 3, %v2573_v19  ;;  %v1023_v36 = vsub.s32 6, %v2573_v19  ;;  %v606_v37 = vadd.s32 8, %v2573_v19  ;;  %v608_v41 = vadd.s32 24, %v2573_v19  ;;  %v1061_v4 = vld [vmem:[#allocation2 + $0x28] sm:$0xff]  ;;  %v1062_v5 = vld [vmem:[#allocation2 + $0x30] sm:$0xff] }
 0x293   : > { %v643_v27 = vand.u32 15, %v607_v21  ;;  %v657_v28 = vand.u32 15, %v609_v22  ;;  %2201 = vmatpush3.bf16.msra.mxu0 %v2272_v18  ;;  %2223 = vmatpush3.bf16.msra.mxu1 %v2272_v18  ;;  %vm885_vm5 = vcmp.ge.s32.totalorder %v629_v23, 1  ;;  %v2586_v31 = vrot.slane %v2578_v20, %v967_v25  ;;  %v1186_v14 = vld [vmem:[#allocation2 + $0x11] sm:$0xff]  ;;  %v1188_v1 = vld [vmem:[#allocation2 + $0x21] sm:$0xff] }
 0x294   : > { %v2589_v32 = vrot.slane %v2578_v20, %v987_v26  ;;  %v945_v35 = vsel %vm885_vm5, %v865_v24, 0.0  ;;  %v610_v42 = vadd.s32 40, %v2573_v19  ;;  %v2602_v47 = vrot.slane %v2578_v20, %v1023_v36  ;;  %v1190_v22 = vld [vmem:[#allocation2 + $0x31] sm:$0xff]  ;;  %v1185_v26 = vld [vmem:[#allocation2 + $0x9] sm:$0xff]  ;;  %v2652_v36 = vld [vmem:[%s3413_s3 + $0x8] ss:$0 sm:$0xff] }
 0x295   : > { %vm887_vm6 = vcmp.ge.s32.totalorder %v643_v27, 1  ;;  %vm889_vm7 = vcmp.ge.s32.totalorder %v657_v28, 1  ;;  %v969_v39 = vmul.f32 %v2586_v31, %v945_v35  ;;  %v970_v40 = vmul.f32 %v2586_v31, %v866_v29  ;;  %v877_v9 = vld [vmem:[#allocation2 + $0x67] sm:$0xff] }
 0x296   : > { %v947_v38 = vsel %vm887_vm6, %v867_v30, 0.0  ;;  %v949_v44 = vsel %vm889_vm7, %v869_v34, 0.0  ;;  %v990_v46 = vmul.f32 %v2589_v32, %v868_v33  ;;  %v1079_v48 = vsub.s32 1, %v2573_v19 }
 0x297   : > { %v989_v45 = vmul.f32 %v2589_v32, %v947_v38  ;;  %v1115_v49 = vsub.s32 4, %v2573_v19  ;;  %v1151_v50 = vsub.s32 7, %v2573_v19  ;;  %v636_v51 = vand.u32 15, %v606_v37  ;;  %v2654_v37 = vld [vmem:[#allocation2 + $0x29] sm:$0xff] }
 0x298   : > { %v1006_v53 = vadd.f32 %v990_v46, %v970_v40  ;;  %v1025_v56 = vmul.f32 %v2602_v47, %v949_v44  ;;  %v1026_v57 = vmul.f32 %v2602_v47, %v2597_v43  ;;  %v2611_v58 = vrot.slane %v2578_v20, %v1079_v48 }
 0x299   : > { %v1005_v52 = vadd.f32 %v989_v45, %v969_v39  ;;  %v2614_v59 = vrot.slane %v2578_v20, %v1115_v49  ;;  %v650_v60 = vand.u32 15, %v608_v41  ;;  %v664_v61 = vand.u32 15, %v610_v42 }
 0x29a   : > { %3445 = vst [vmem:[#allocation3_spill] sm:$0xff] %v2611_v58  ;;  %v2617_v0 = vrot.slane %v2578_v20, %v1151_v50  ;;  %v1042_v3 = vadd.f32 %v1026_v57, %v1006_v53  ;;  %v1081_v6 = vmul.f32 %v2611_v58, %v1057_v54  ;;  %v1082_v7 = vmul.f32 %v2611_v58, %v1058_v55 }
 0x29b   : > { %3446 = vst [vmem:[#allocation4_spill] sm:$0xff] %v2614_v59  ;;  %v1041_v2 = vadd.f32 %v1025_v56, %v1005_v52  ;;  %v2622_v8 = vmul.f32 %v2586_v31, %v947_v38  ;;  %vm2624_vm8 = vcmp.lt.s32.totalorder %v636_v51, 15  ;;  %v1117_v12 = vmul.f32 %v2614_v59, %v1059_v62 }
 0x29c   : > { %v1098_v11 = vadd.f32 %v1082_v7, %v1042_v3  ;;  %v1118_v13 = vmul.f32 %v2614_v59, %v1060_v63  ;;  %v2631_v15 = vmul.f32 %v2586_v31, %v868_v33  ;;  %v1153_v16 = vmul.f32 %v2617_v0, %v1061_v4  ;;  %v1187_v33 = vld [vmem:[#allocation2 + $0x19] sm:$0xff] }
 0x29d   : > { %v1097_v10 = vadd.f32 %v1081_v6, %v1041_v2  ;;  %v1154_v17 = vmul.f32 %v2617_v0, %v1062_v5  ;;  %vm1208_vm9 = vcmp.lt.s32.totalorder %v650_v60, 15  ;;  %vm1210_vm10 = vcmp.lt.s32.totalorder %v664_v61, 15  ;;  %v873_v60 = vld [vmem:[#allocation2 + $0x47] sm:$0xff]  ;;  %v2691_v6 = vld [vmem:[#allocation2 + $0x4f] sm:$0xff]  ;;  %v875_v7 = vld [vmem:[#allocation2 + $0x57] sm:$0xff] }
 0x29e   : > { %v1134_v21 = vadd.f32 %v1118_v13, %v1098_v11  ;;  %v1287_v23 = vsub.s32 2, %v2573_v19  ;;  %v2637_v24 = vmul.f32 %v2586_v31, %v949_v44  ;;  %v2641_v25 = vmul.f32 %v2586_v31, %v2597_v43  ;;  %v2702_v11 = vld [vmem:[%s3414_s4] ss:$0 sm:$0xff] }
 0x29f   : > { %v1133_v18 = vadd.f32 %v1117_v12, %v1097_v10  ;;  %v1266_v27 = vsel %vm2624_vm8, %v1186_v14, 0.0  ;;  %v1323_v28 = vsub.s32 5, %v2573_v19  ;;  %v1268_v34 = vsel %vm1208_vm9, %v1188_v1, 0.0  ;;  %v2704_v14 = vld [vmem:[#allocation2 + $0x5f] sm:$0xff] }
 0x2a0   : > { %3449 = vst [vmem:[#allocation5_spill] sm:$0xff] %v2641_v25  ;;  %v1170_v30 = vadd.f32 %v1154_v17, %v1134_v21  ;;  %v2647_v35 = vrot.slane %v2578_v20, %v1287_v23  ;;  %v2656_v38 = vsel %vm1210_vm10, %v1190_v22, 0.0  ;;  %v613_v40 = vadd.s32 64, %v2573_v19  ;;  %3453 = vst [vmem:[#allocation9_spill] sm:$0xff] %v2704_v14  ;;  %v878_v23 = vld [vmem:[#allocation2 + $0x6f] sm:$0xff] }
 0x2a1   : > { %v1169_v29 = vadd.f32 %v1153_v16, %v1133_v18  ;;  %v2659_v39 = vrot.slane %v2578_v20, %v1323_v28  ;;  %v615_v41 = vadd.s32 80, %v2573_v19  ;;  %v2664_v42 = vmul.f32 %v2589_v32, %v949_v44 }
 0x2a2   : > { %3450 = vst [vmem:[#allocation6_spill] sm:$0xff] %v2647_v35  ;;  %v1289_v45 = vmul.f32 %v2647_v35, %v1185_v26  ;;  %v1290_v46 = vmul.f32 %v2647_v35, %v1266_v27  ;;  %v617_v48 = vadd.s32 96, %v2573_v19  ;;  %v2671_v49 = vmul.f32 %v2589_v32, %v2597_v43  ;;  %v2721_v27 = vld [vmem:[#allocation2 + $0x48] sm:$0xff] }
 0x2a3   : > { %v2674_v20 = vmul.f32 %v2611_v58, %v1059_v62  ;;  %v1325_v50 = vmul.f32 %v2659_v39, %v1187_v33  ;;  %v1326_v51 = vmul.f32 %v2659_v39, %v1268_v34  ;;  %v1361_v53 = vmul.f32 %v2652_v36, %v2654_v37  ;;  %3455 = vst [vmem:[#allocation11_spill] sm:$0xff] %v2721_v27 }
 0x2a4   : > { %v1305_v52 = vadd.f32 %v1289_v45, %v1169_v29  ;;  %v1306_v44 = vadd.f32 %v1290_v46, %v1170_v30  ;;  %v1362_v54 = vmul.f32 %v2652_v36, %v2656_v38  ;;  %v2683_v55 = vmul.f32 %v2611_v58, %v1060_v63 }
 0x2a5   : > { %v2686_v43 = vmul.f32 %v2611_v58, %v1061_v4  ;;  %v685_v56 = vand.u32 15, %v613_v40  ;;  %v699_v57 = vand.u32 15, %v615_v41  ;;  %v2689_v61 = vmul.f32 %v2611_v58, %v1062_v5 }
 0x2a6   : > { %v1341_v62 = vadd.f32 %v1325_v50, %v1305_v52  ;;  %v1342_v2 = vadd.f32 %v1326_v51, %v1306_v44  ;;  %v713_v3 = vand.u32 15, %v617_v48  ;;  %v2694_v10 = vmul.f32 %v2614_v59, %v1061_v4  ;;  %v2739_v50 = vld [vmem:[#allocation2 + $0x50] sm:$0xff] }
 0x2a7   : > { %3451 = vst [vmem:[#allocation7_spill] sm:$0xff] %v2686_v43  ;;  %3452 = vst [vmem:[#allocation8_spill] sm:$0xff] %v2689_v61  ;;  %v2697_v63 = vmul.f32 %v2614_v59, %v1062_v5  ;;  %vm893_vm11 = vcmp.ge.s32.totalorder %v685_v56, 1  ;;  %vm895_vm12 = vcmp.ge.s32.totalorder %v699_v57, 1  ;;  %v978_v1 = vmul.f32 %v2586_v31, %v2691_v6  ;;  %v1198_v61 = vld [vmem:[#allocation2 + $0x71] sm:$0xff]  ;;  %v2790_v43 = vld [vmem:[#allocation2 + $0x59] sm:$0xff] }
 0x2a8   : > { %v1377_v12 = vadd.f32 %v1361_v53, %v1341_v62  ;;  %v1378_v13 = vadd.f32 %v1362_v54, %v1342_v2  ;;  %vm897_vm13 = vcmp.ge.s32.totalorder %v713_v3, 1  ;;  %v2706_v16 = vsel %vm893_vm11, %v873_v60, 0.0  ;;  %3456 = vst [vmem:[#allocation12_spill] sm:$0xff] %v2739_v50  ;;  %v2758_v2 = vld [vmem:[#allocation2 + $0x58] sm:$0xff]  ;;  %3464 = vst [vmem:[#allocation20_spill] sm:$0xff] %v2790_v43 }
 0x2a9   : > { %v2708_v17 = vsel %vm895_vm12, %v875_v7, 0.0  ;;  %v957_v4 = vsel %vm897_vm13, %v877_v9, 0.0  ;;  %v977_v5 = vmul.f32 %v2586_v31, %v2706_v16  ;;  %v614_v22 = vadd.s32 72, %v2573_v19  ;;  %3459 = vst [vmem:[#allocation15_spill] sm:$0xff] %v2758_v2 }
 0x2aa   : > { %3454 = vst [vmem:[#allocation10_spill] sm:$0xff] %v2708_v17  ;;  %v1400_v18 = vadd.f32 %v2702_v11, %v1377_v12  ;;  %v2716_v21 = vadd.f32 %v2702_v11, %v1378_v13  ;;  %v997_v26 = vmul.f32 %v2589_v32, %v2708_v17  ;;  %v2724_v28 = vmul.f32 %v2647_v35, %v1187_v33 }
 0x2ab   : > { %v616_v29 = vadd.s32 88, %v2573_v19  ;;  %v998_v30 = vmul.f32 %v2589_v32, %v2704_v14  ;;  %v1033_v40 = vmul.f32 %v2602_v47, %v957_v4  ;;  %v2731_v41 = vmul.f32 %v2647_v35, %v1268_v34 }
 0x2ac   : > { %v2733_v45 = vmul.f32 0.70710677, %v1400_v18  ;;  %v2736_v46 = vmul.f32 0.70710677, %v2716_v21  ;;  %v618_v48 = vadd.s32 104, %v2573_v19  ;;  %v1013_v33 = vadd.f32 %v997_v26, %v977_v5  ;;  %v2766_v5 = vld [vmem:[#allocation2 + $0x60] sm:$0xff] }
 0x2ad   : > { %v1014_v51 = vadd.f32 %v998_v30, %v978_v1  ;;  %v1034_v52 = vmul.f32 %v2602_v47, %v878_v23  ;;  %v1089_v44 = vmul.f32 %v2611_v58, %v2721_v27  ;;  %v2746_v34 = vmul.f32 %v2647_v35, %v2654_v37  ;;  %3460 = vst [vmem:[#allocation16_spill] sm:$0xff] %v2766_v5 }
 0x2ae   : > { %v2750_v53 = vmul.f32 %v2647_v35, %v2656_v38  ;;  %v1448_v54 = vand.u32 2147483647, %v2733_v45  ;;  %v1449_v56 = vand.u32 2147483647, %v2736_v46  ;;  %v2756_v57 = vmul.f32 %v2659_v39, %v2654_v37 }
 0x2af   : > { %3457 = vst [vmem:[#allocation13_spill] sm:$0xff] %v2746_v34  ;;  %v1049_v60 = vadd.f32 %v1033_v40, %v1013_v33  ;;  %v1050_v62 = vadd.f32 %v1034_v52, %v1014_v51  ;;  %v1090_v3 = vmul.f32 %v2611_v58, %v2739_v50  ;;  %v2764_v7 = vmul.f32 %v2659_v39, %v2656_v38  ;;  %v1070_v34 = vld [vmem:[#allocation2 + $0x70] sm:$0xff] }
 0x2b0   : > { %3458 = vst [vmem:[#allocation14_spill] sm:$0xff] %v2750_v53  ;;  %v1464_v9 = vmul.f32 0.3275911, %v1448_v54  ;;  %v1465_v12 = vmul.f32 0.3275911, %v1449_v56  ;;  %v692_v13 = vand.u32 15, %v614_v22  ;;  %v2769_v37 = vmul.f32 %v2586_v31, %v878_v23 }
 0x2b1   : > { %v706_v1 = vand.u32 15, %v616_v29  ;;  %v720_v26 = vand.u32 15, %v618_v48  ;;  %v1105_v30 = vadd.f32 %v1089_v44, %v1049_v60  ;;  %v1656_v51 = vsub.f32 0.0, %v1448_v54  ;;  %v1069_v53 = vld [vmem:[#allocation2 + $0x68] sm:$0xff] }
 0x2b2   : > { %3461 = vst [vmem:[#allocation17_spill] sm:$0xff] %v2769_v37  ;;  %v1480_v40 = vadd.f32 1.0, %v1464_v9  ;;  %v1481_v33 = vadd.f32 1.0, %v1465_v12  ;;  %v2772_v52 = vmul.f32 %v2586_v31, %v957_v4  ;;  %v1657_v38 = vsub.f32 0.0, %v1449_v56  ;;  %v1194_v9 = vld [vmem:[#allocation2 + $0x51] sm:$0xff] }
 0x2b3   : > { %v1106_v50 = vadd.f32 %v1090_v3, %v1050_v62  ;;  %v1125_v22 = vmul.f32 %v2614_v59, %v2758_v2  ;;  %v1126_v29 = vmul.f32 %v2614_v59, %v2766_v5  ;;  %v2778_v48 = vmul.f32 0.5, %v1400_v18  ;;  %v2787_v3 = vld [vmem:[#allocation2 + $0x49] sm:$0xff] }
 0x2b4   : > { %3462 = vst [vmem:[#allocation18_spill] sm:$0xff] %v2772_v52  ;;  %2273 = vrcp.f32 %v1480_v40  ;;  %v2781_v44 = vmul.f32 %v2589_v32, %v957_v4  ;;  %v2784_v60 = vmul.f32 %v2589_v32, %v878_v23  ;;  %v1161_v62 = vmul.f32 %v2617_v0, %v1069_v53  ;;  %3463 = vst [vmem:[#allocation19_spill] sm:$0xff] %v2787_v3  ;;  %v1196_v52 = vld [vmem:[#allocation2 + $0x61] sm:$0xff] }
 0x2b5   : > { %2275 = vrcp.f32 %v1481_v33  ;;  %v1141_v12 = vadd.f32 %v1125_v22, %v1105_v30  ;;  %v1142_v37 = vadd.f32 %v1126_v29, %v1106_v50  ;;  %v1672_v27 = vmul.f32 %v1656_v51, %v1448_v54  ;;  %v2797_v33 = vld [vmem:[#allocation2 + $0x69] sm:$0xff] }
 0x2b6   : > { %v1162_v18 = vmul.f32 %v2617_v0, %v1070_v34  ;;  %vm1214_vm14 = vcmp.lt.s32.totalorder %v692_v13, 15  ;;  %vm1216_vm15 = vcmp.lt.s32.totalorder %v706_v1, 15  ;;  %v1673_v4 = vmul.f32 %v1657_v38, %v1449_v56  ;;  %v2819_v38 = vld [vmem:[#allocation2 + $0x3f] sm:$0xff] }
 0x2b7   : > { %v1177_v40 = vadd.f32 %v1161_v62, %v1141_v12  ;;  %vm1218_vm0 = vcmp.lt.s32.totalorder %v720_v26, 15  ;;  %v2792_v23 = vsel %vm1214_vm14, %v1194_v9, 0.0  ;;  %v2795_v50 = vmul.f32 0.5, %v2716_v21 }
 0x2b8   : > { %3465 = vst [vmem:[#allocation21_spill] sm:$0xff] %v2792_v23  ;;  %v1178_v30 = vadd.f32 %v1162_v18, %v1142_v37  ;;  %v2799_v22 = vsel %vm1216_vm15, %v1196_v52, 0.0  ;;  %v1297_v54 = vmul.f32 %v2647_v35, %v2787_v3  ;;  %v2805_v56 = vmul.f32 %v2611_v58, %v2758_v2  ;;  %v871_v2 = vld [vmem:[#allocation2 + $0x37] sm:$0xff]  ;;  %v1192_v3 = vld [vmem:[#allocation2 + $0x41] sm:$0xff] }
 0x2b9   : > { %3466 = vst [vmem:[#allocation22_spill] sm:$0xff] %v2799_v22  ;;  %v2809_v13 = vmul.f32 %v2611_v58, %v2766_v5  ;;  %v2811_v1 = vsel %vm1218_vm0, %v1198_v61, 0.0  ;;  %v1298_v21 = vmul.f32 %v2647_v35, %v2792_v23  ;;  %v1688_v26 = vmul.f32 1.442695, %v1672_v27 }
 0x2ba   : > { %v1313_v37 = vadd.f32 %v1297_v54, %v1177_v40  ;;  %v1333_v51 = vmul.f32 %v2659_v39, %v2790_v43  ;;  %v1334_v52 = vmul.f32 %v2659_v39, %v2799_v22  ;;  %v1690_v29 = vmul.f32 1.442695, %v1673_v4 }
 0x2bb   : > { %v2822_v9 = vmul.f32 %v2611_v58, %v1069_v53  ;;  %v1314_v12 = vadd.f32 %v1298_v21, %v1178_v30  ;;  %v1369_v61 = vmul.f32 %v2652_v36, %v2797_v33  ;;  %v1370_v27 = vmul.f32 %v2652_v36, %v2811_v1 }
 0x2bc   : > { %v1349_v62 = vadd.f32 %v1333_v51, %v1313_v37  ;;  %v611_v18 = vadd.s32 48, %v2573_v19  ;;  %v612_v40 = vadd.s32 56, %v2573_v19  ;;  %v2831_v54 = vmul.f32 %v2611_v58, %v1070_v34 }
 0x2bd   : > { %3467 = vst [vmem:[#allocation23_spill] sm:$0xff] %v2822_v9  ;;  %v1350_v5 = vadd.f32 %v1334_v52, %v1314_v12  ;;  %v1008_v4 = vadd.f32 %v2671_v49, %v2631_v15  ;;  %v1028_v30 = vmul.f32 %v2602_v47, %v2819_v38  ;;  %2277 = vpow2.f32 %v1688_v26  ;;  %v2840_v9 = vld [vmem:[#allocation2 + $0x40] sm:$0xff] }
 0x2be   : > { %3468 = vst [vmem:[#allocation24_spill] sm:$0xff] %v2831_v54  ;;  %v2838_v21 = vmul.f32 %v2614_v59, %v1069_v53  ;;  %v1385_v37 = vadd.f32 %v1369_v61, %v1349_v62  ;;  %v671_v51 = vand.u32 15, %v611_v18  ;;  %3469 = vst [vmem:[#allocation25_spill] sm:$0xff] %v2840_v9  ;;  %2279 = vpow2.f32 %v1690_v29  ;;  %v2857_v29 = vld [vmem:[#allocation2 + $0x38] sm:$0xff] }
 0x2bf   : > { %v2843_v58 = vmul.f32 %v2614_v59, %v1070_v34  ;;  %v1386_v52 = vadd.f32 %v1370_v27, %v1350_v5  ;;  %v1044_v12 = vadd.f32 %v1028_v30, %v1008_v4  ;;  %v678_v49 = vand.u32 15, %v612_v40  ;;  %3470 = vst [vmem:[#allocation26_spill] sm:$0xff] %v2857_v29 }
 0x2c0   : > { %v2846_v15 = vadd.f32 %v2702_v11, %v1385_v37  ;;  %vm891_vm3 = vcmp.ge.s32.totalorder %v671_v51, 1  ;;  %v1007_v53 = vadd.f32 %v2664_v42, %v2622_v8  ;;  %v1156_v5 = vmul.f32 %v2617_v0, %v2840_v9 }
 0x2c1   : > { %v2850_v26 = vpop.eup %2273  ;;  %v2853_v61 = vadd.f32 %v2702_v11, %v1386_v52  ;;  %v2855_v62 = vsel %vm891_vm3, %v871_v2, 0.0  ;;  %v1100_v34 = vadd.f32 %v2683_v55, %v1044_v12  ;;  %v2867_v8 = vmul.f32 %v2647_v35, %v2790_v43 }
 0x2c2   : > { %v2862_v27 = vpop.eup %2275  ;;  %v1512_v18 = vmul.f32 1.0614054, %v2850_v26  ;;  %v2870_v42 = vmul.f32 0.70710677, %v2846_v15  ;;  %v1027_v2 = vmul.f32 %v2602_v47, %v2855_v62  ;;  %v2877_v55 = vmul.f32 %v2647_v35, %v2799_v22 }
 0x2c3   : > { %v1513_v40 = vmul.f32 1.0614054, %v2862_v27  ;;  %v2880_v4 = vmul.f32 0.70710677, %v2853_v61  ;;  %v1136_v30 = vadd.f32 %v2697_v63, %v1100_v34  ;;  %v1155_v12 = vmul.f32 %v2617_v0, %v2857_v29 }
 0x2c4   : > { %v1528_v37 = vadd.f32 -1.4531521, %v1512_v18  ;;  %v1456_v51 = vand.u32 2147483647, %v2870_v42  ;;  %v1043_v52 = vadd.f32 %v1027_v2, %v1007_v53  ;;  %vm1212_vm4 = vcmp.lt.s32.totalorder %v678_v49, 15 }
 0x2c5   : > { %3471 = vst [vmem:[#allocation27_spill] sm:$0xff] %v2880_v4  ;;  %v1529_v43 = vadd.f32 -1.4531521, %v1513_v40  ;;  %v1457_v54 = vand.u32 2147483647, %v2880_v4  ;;  %v1172_v23 = vadd.f32 %v1156_v5, %v1136_v30  ;;  %v619_v18 = vadd.s32 112, %v2573_v19 }
 0x2c6   : > { %v1544_v22 = vmul.f32 %v2850_v26, %v1528_v37  ;;  %v1472_v9 = vmul.f32 0.3275911, %v1456_v51  ;;  %v1664_v59 = vsub.f32 0.0, %v1456_v51  ;;  %v1099_v25 = vadd.f32 %v2674_v20, %v1043_v52  ;;  %v2895_v4 = vld [vmem:[#allocation2 + $0x39] sm:$0xff] }
 0x2c7   : > { %v1545_v63 = vmul.f32 %v2862_v27, %v1529_v43  ;;  %v1473_v34 = vmul.f32 0.3275911, %v1457_v54  ;;  %v1308_v53 = vadd.f32 %v2731_v41, %v1172_v23  ;;  %v2893_v5 = vsel %vm1212_vm4, %v1192_v3, 0.0 }
 0x2c8   : > { %v1560_v2 = vadd.f32 1.4214138, %v1544_v22  ;;  %v1488_v40 = vadd.f32 1.0, %v1472_v9  ;;  %v1135_v29 = vadd.f32 %v2694_v10, %v1099_v25  ;;  %v1665_v37 = vsub.f32 0.0, %v1457_v54 }
 0x2c9   : > { %v1561_v49 = vadd.f32 1.4214138, %v1545_v63  ;;  %v1489_v30 = vadd.f32 1.0, %v1473_v34  ;;  %v1344_v20 = vadd.f32 %v2764_v7, %v1308_v53  ;;  %v1680_v52 = vmul.f32 %v1664_v59, %v1456_v51  ;;  %v879_v53 = vld [vmem:[#allocation2 + $0x77] sm:$0xff] }
 0x2ca   : > { %v1576_v43 = vmul.f32 %v2850_v26, %v1560_v2  ;;  %2281 = vrcp.f32 %v1488_v40  ;;  %v1171_v41 = vadd.f32 %v1155_v12, %v1135_v29  ;;  %v2278_v23 = vpop.eup %2277  ;;  %v2902_v25 = vmul.f32 %v2647_v35, %v2797_v33 }
 0x2cb   : > { %v1577_v22 = vmul.f32 %v2862_v27, %v1561_v49  ;;  %2283 = vrcp.f32 %v1489_v30  ;;  %v1364_v10 = vmul.f32 %v2652_v36, %v2893_v5  ;;  %v2280_v3 = vpop.eup %2279  ;;  %v2908_v7 = vmul.f32 %v2647_v35, %v2811_v1 }
 0x2cc   : > { %v1592_v9 = vadd.f32 -0.28449672, %v1576_v43  ;;  %v1307_v59 = vadd.f32 %v2724_v28, %v1171_v41  ;;  %v1363_v29 = vmul.f32 %v2652_v36, %v2895_v4  ;;  %v1681_v12 = vmul.f32 %v1665_v37, %v1457_v54  ;;  %v2922_v41 = vld [vmem:[#allocation2 + $0x7f] sm:$0xff] }
 0x2cd   : > { %3472 = vst [vmem:[#allocation28_spill] sm:$0xff] %v2908_v7  ;;  %v1593_v51 = vadd.f32 -0.28449672, %v1577_v22  ;;  %v1380_v63 = vadd.f32 %v1364_v10, %v1344_v20  ;;  %v727_v34 = vand.u32 15, %v619_v18  ;;  %v1704_v40 = vmul.f32 1.442695, %v1680_v52 }
 0x2ce   : > { %v1608_v2 = vmul.f32 %v2850_v26, %v1592_v9  ;;  %v1343_v49 = vadd.f32 %v2756_v57, %v1307_v59  ;;  %v979_v30 = vmul.f32 %v2586_v31, %v2708_v17  ;;  %vm1752_vm5 = vcmp.ge.f32.partialorder %v2733_v45, 0.0  ;;  %v2974_v7 = vld [vmem:[#allocation2 + $0x80] sm:$0xff] }
 0x2cf   : > { %v1609_v43 = vmul.f32 %v2862_v27, %v1593_v51  ;;  %v2920_v28 = vadd.f32 %v2702_v11, %v1380_v63  ;;  %vm899_vm6 = vcmp.ge.s32.totalorder %v727_v34, 1  ;;  %v980_v54 = vmul.f32 %v2586_v31, %v2704_v14  ;;  %v2979_v45 = vld [vmem:[#allocation2 + $0x79] sm:$0xff] }
 0x2d0   : > { %v1624_v18 = vadd.f32 0.2548296, %v1608_v2  ;;  %vm1753_vm7 = vcmp.ge.f32.partialorder %v2736_v46, 0.0  ;;  %v1379_v57 = vadd.f32 %v1363_v29, %v1343_v49  ;;  %v2927_v37 = vsel %vm899_vm6, %v879_v53, 0.0 }
 0x2d1   : > { %v1015_v20 = vadd.f32 %v2781_v44, %v979_v30  ;;  %v1625_v52 = vadd.f32 0.2548296, %v1609_v43  ;;  %v1706_v22 = vmul.f32 1.442695, %v1681_v12  ;;  %v2931_v10 = vmul.f32 0.70710677, %v2920_v28 }
 0x2d2   : > { %v1016_v9 = vadd.f32 %v2784_v60, %v980_v54  ;;  %v1640_v59 = vmul.f32 %v2850_v26, %v1624_v18  ;;  %v2936_v51 = vadd.f32 %v2702_v11, %v1379_v57  ;;  %v1035_v63 = vmul.f32 %v2602_v47, %v2927_v37 }
 0x2d3   : > { %v1036_v29 = vmul.f32 %v2602_v47, %v2922_v41  ;;  %v1641_v44 = vmul.f32 %v2862_v27, %v1625_v52  ;;  %v2945_v12 = vmul.f32 %v2659_v39, %v2797_v33  ;;  %v1451_v34 = vand.u32 2147483647, %v2931_v10 }
 0x2d4   : > { %v620_v60 = vadd.s32 120, %v2573_v19  ;;  %v1720_v26 = vmul.f32 %v2278_v23, %v1640_v59  ;;  %v2951_v53 = vmul.f32 %v2659_v39, %v2811_v1  ;;  %v2954_v2 = vmul.f32 0.70710677, %v2936_v51 }
 0x2d5   : > { %v1051_v49 = vadd.f32 %v1035_v63, %v1015_v20  ;;  %v1721_v30 = vmul.f32 %v2280_v3, %v1641_v44  ;;  %2285 = vpow2.f32 %v1704_v40  ;;  %v1467_v27 = vmul.f32 0.3275911, %v1451_v34 }
 0x2d6   : > { %v1052_v43 = vadd.f32 %v1036_v29, %v1016_v9  ;;  %v1736_v54 = vsub.f32 1.0, %v1720_v26  ;;  %v2957_v33 = vmul.f32 0.5, %v2846_v15  ;;  %2287 = vpow2.f32 %v1706_v22  ;;  %v2965_v9 = vld [vmem:[#allocation2 + $0x78] sm:$0xff] }
 0x2d7   : > { %v1450_v18 = vand.u32 2147483647, %v2954_v2  ;;  %v2960_v23 = vpop.eup %2281  ;;  %v1737_v57 = vsub.f32 1.0, %v1721_v30  ;;  %v1483_v1 = vadd.f32 1.0, %v1467_v27  ;;  %v1659_v52 = vsub.f32 0.0, %v1451_v34 }
 0x2d8   : > { %v734_v59 = vand.u32 15, %v620_v60  ;;  %v2962_v35 = vpop.eup %2283  ;;  %v1768_v20 = vsub.f32 0.0, %v1736_v54  ;;  %v1520_v3 = vmul.f32 1.0614054, %v2960_v23  ;;  %v1107_v15 = vadd.f32 %v2805_v56, %v1051_v49 }
 0x2d9   : > { %v1466_v40 = vmul.f32 0.3275911, %v1450_v18  ;;  %v1769_v63 = vsub.f32 0.0, %v1737_v57  ;;  %v1521_v22 = vmul.f32 1.0614054, %v2962_v35  ;;  %2289 = vrcp.f32 %v1483_v1 }
 0x2da   : > { %v1108_v29 = vadd.f32 %v2809_v13, %v1052_v43  ;;  %v1784_v44 = vsel %vm1752_vm5, %v1736_v54, %v1768_v20  ;;  %v1536_v60 = vadd.f32 -1.4531521, %v1520_v3  ;;  %v1658_v30 = vsub.f32 0.0, %v1450_v18  ;;  %v1200_v20 = vld [vmem:[#allocation2 + $0x81] sm:$0xff] }
 0x2db   : > { %v1482_v26 = vadd.f32 1.0, %v1466_v40  ;;  %v1785_v27 = vsel %vm1753_vm7, %v1737_v57, %v1769_v63  ;;  %v1800_v14 = vadd.f32 1.0, %v1784_v44  ;;  %v1537_v17 = vadd.f32 -1.4531521, %v1521_v22 }
 0x2dc   : > { %v1163_v56 = vmul.f32 %v2617_v0, %v2965_v9  ;;  %v1801_v49 = vadd.f32 1.0, %v1785_v27  ;;  %v1552_v1 = vmul.f32 %v2960_v23, %v1536_v60  ;;  %v1675_v13 = vmul.f32 %v1659_v52, %v1451_v34 }
 0x2dd   : > { %2291 = vrcp.f32 %v1482_v26  ;;  %v1816_v43 = vmul.f32 %v1800_v14, %v2778_v48  ;;  %v1553_v54 = vmul.f32 %v2962_v35, %v1537_v17  ;;  %v1143_v46 = vadd.f32 %v2838_v21, %v1107_v15 }
 0x2de   : > { %v1144_v57 = vadd.f32 %v2843_v58, %v1108_v29  ;;  %v1817_v3 = vmul.f32 %v1801_v49, %v2795_v50  ;;  %v1568_v40 = vadd.f32 1.4214138, %v1552_v1  ;;  %v1674_v63 = vmul.f32 %v1658_v30, %v1450_v18 }
 0x2df   : > { %v1164_v22 = vmul.f32 %v2617_v0, %v2974_v7  ;;  %v1569_v44 = vadd.f32 1.4214138, %v1553_v54  ;;  %v1179_v34 = vadd.f32 %v1163_v56, %v1143_v46  ;;  %vm1220_vm8 = vcmp.lt.s32.totalorder %v734_v59, 15  ;;  %v3473_v46 = vld [vmem:[#allocation5_spill] sm:$0xff] }
 0x2e0   : > { %v1371_v14 = vmul.f32 %v2652_v36, %v2979_v45  ;;  %v1832_v48 = vpack.c.bf16 %v1817_v3, %v1816_v43  ;;  %v1584_v17 = vmul.f32 %v2960_v23, %v1568_v40  ;;  %v2991_v52 = vsel %vm1220_vm8, %v1200_v20, 0.0 }
 0x2e1   : > { %v1180_v21 = vadd.f32 %v1164_v22, %v1144_v57  ;;  %v1585_v58 = vmul.f32 %v2962_v35, %v1569_v44  ;;  %v1315_v50 = vadd.f32 %v2867_v8, %v1179_v34  ;;  %v1372_v18 = vmul.f32 %v2652_v36, %v2991_v52 }
 0x2e2   : > { %v993_v15 = vmul.f32 %v2589_v32, %v2855_v62  ;;  %v2286_v59 = vpop.eup %2285  ;;  %2202 = vmatprep.mubr.msk.bf16.mxu0 %vm307_vm1, %v1832_v48  ;;  %v1600_v29 = vadd.f32 -0.28449672, %v1584_v17  ;;  %v994_v26 = vmul.f32 %v2589_v32, %v2819_v38  ;;  %v1029_v30 = vmul.f32 %v2602_v47, %v2706_v16 }
 0x2e3   : > { %v1316_v60 = vadd.f32 %v2877_v55, %v1180_v21  ;;  %v2288_v27 = vpop.eup %2287  ;;  %v1601_v8 = vadd.f32 -0.28449672, %v1585_v58  ;;  %v1351_v56 = vadd.f32 %v2945_v12, %v1315_v50  ;;  %v1030_v1 = vmul.f32 %v2602_v47, %v2691_v6  ;;  %v3474_v21 = vld [vmem:[#allocation7_spill] sm:$0xff] }
 0x2e4   : > { %v1009_v49 = vadd.f32 %v993_v15, %v2637_v24  ;;  %v3010_v43 = vmul.f32 0.5, %v2853_v61  ;;  %v1616_v55 = vmul.f32 %v2960_v23, %v1600_v29  ;;  %v1010_v57 = vadd.f32 %v994_v26, %v3473_v46  ;;  %v3475_v15 = vld [vmem:[#allocation27_spill] sm:$0xff] }
 0x2e5   : > { %v1352_v54 = vadd.f32 %v2951_v53, %v1316_v60  ;;  %v1617_v20 = vmul.f32 %v2962_v35, %v1601_v8  ;;  %vm1760_vm9 = vcmp.ge.f32.partialorder %v2870_v42, 0.0  ;;  %v1694_v3 = vmul.f32 1.442695, %v1675_v13 }
 0x2e6   : > { %v1387_v12 = vadd.f32 %v1371_v14, %v1351_v56  ;;  %v1045_v40 = vadd.f32 %v1029_v30, %v1009_v49  ;;  %v3017_v24 = vpop.eup %2289  ;;  %v1632_v22 = vadd.f32 0.2548296, %v1616_v55  ;;  %v1692_v44 = vmul.f32 1.442695, %v1674_v63  ;;  %v3476_v14 = vld [vmem:[#allocation8_spill] sm:$0xff] }
 0x2e7   : > { %v1388_v34 = vadd.f32 %v1372_v18, %v1352_v54  ;;  %v1046_v61 = vadd.f32 %v1030_v1, %v1010_v57  ;;  %v1633_v48 = vadd.f32 0.2548296, %v1617_v20  ;;  %v1515_v17 = vmul.f32 1.0614054, %v3017_v24  ;;  %v3477_v57 = vld [vmem:[#allocation26_spill] sm:$0xff] }
 0x2e8   : > { %v3021_v53 = vadd.f32 %v2702_v11, %v1387_v12  ;;  %v1101_v58 = vadd.f32 %v3474_v21, %v1045_v40  ;;  %v1648_v50 = vmul.f32 %v2960_v23, %v1632_v22  ;;  %vm1761_vm10 = vcmp.ge.f32.partialorder %v3475_v15, 0.0  ;;  %v3479_v40 = vld [vmem:[#allocation25_spill] sm:$0xff] }
 0x2e9   : > { %v3027_v13 = vadd.f32 %v2702_v11, %v1388_v34  ;;  %v1102_v29 = vadd.f32 %v3476_v14, %v1046_v61  ;;  %v1649_v18 = vmul.f32 %v2962_v35, %v1633_v48  ;;  %v1531_v60 = vadd.f32 -1.4531521, %v1515_v17 }
 0x2ea   : > { %v3030_v63 = vpop.eup %2291  ;;  %2293 = vpow2.f32 %v1694_v3  ;;  %v3034_v26 = vmul.f32 0.70710677, %v3021_v53  ;;  %v1728_v30 = vmul.f32 %v2286_v59, %v1648_v50  ;;  %v3037_v8 = vmul.f32 0.5, %v2920_v28  ;;  %v3478_v59 = vld [vmem:[#allocation4_spill] sm:$0xff] }
 0x2eb   : > { %v1514_v23 = vmul.f32 1.0614054, %v3030_v63  ;;  %v3041_v56 = vmul.f32 0.70710677, %v3027_v13  ;;  %v1729_v49 = vmul.f32 %v2288_v27, %v1649_v18  ;;  %v1547_v1 = vmul.f32 %v3017_v24, %v1531_v60 }
 0x2ec   : > { %2295 = vpow2.f32 %v1692_v44  ;;  %v1458_v35 = vand.u32 2147483647, %v3034_v26  ;;  %v1744_v55 = vsub.f32 1.0, %v1728_v30  ;;  %v1121_v20 = vmul.f32 %v3478_v59, %v3477_v57  ;;  %v3480_v44 = vld [vmem:[#allocation11_spill] sm:$0xff]  ;;  %v3481_v57 = vld [vmem:[#allocation12_spill] sm:$0xff] }
 0x2ed   : > { %v1530_v54 = vadd.f32 -1.4531521, %v1514_v23  ;;  %v1459_v46 = vand.u32 2147483647, %v3041_v56  ;;  %v1745_v28 = vsub.f32 1.0, %v1729_v49  ;;  %v1122_v22 = vmul.f32 %v3478_v59, %v3479_v40 }
 0x2ee   : > { %v1563_v3 = vadd.f32 1.4214138, %v1547_v1  ;;  %v1474_v12 = vmul.f32 0.3275911, %v1458_v35  ;;  %v1776_v34 = vsub.f32 0.0, %v1744_v55  ;;  %v1157_v48 = vmul.f32 %v2617_v0, %v3480_v44 }
 0x2ef   : > { %v1546_v27 = vmul.f32 %v3030_v63, %v1530_v54  ;;  %v1475_v61 = vmul.f32 0.3275911, %v1459_v46  ;;  %v1777_v17 = vsub.f32 0.0, %v1745_v28  ;;  %v1666_v14 = vsub.f32 0.0, %v1458_v35 }
 0x2f0   : > { %v1579_v21 = vmul.f32 %v3017_v24, %v1563_v3  ;;  %v1490_v50 = vadd.f32 1.0, %v1474_v12  ;;  %v1792_v18 = vsel %vm1760_vm9, %v1744_v55, %v1776_v34  ;;  %v1667_v23 = vsub.f32 0.0, %v1459_v46 }
 0x2f1   : > { %v1562_v60 = vadd.f32 1.4214138, %v1546_v27  ;;  %v1491_v30 = vadd.f32 1.0, %v1475_v61  ;;  %v1793_v49 = vsel %vm1761_vm10, %v1745_v28, %v1777_v17  ;;  %v1808_v1 = vadd.f32 1.0, %v1792_v18 }
 0x2f2   : > { %v1595_v54 = vadd.f32 -0.28449672, %v1579_v21  ;;  %2297 = vrcp.f32 %v1490_v50  ;;  %v1809_v40 = vadd.f32 1.0, %v1793_v49  ;;  %v1158_v3 = vmul.f32 %v2617_v0, %v3481_v57 }
 0x2f3   : > { %v1578_v44 = vmul.f32 %v3030_v63, %v1562_v60  ;;  %2299 = vrcp.f32 %v1491_v30  ;;  %v1824_v12 = vmul.f32 %v1808_v1, %v2957_v33  ;;  %v1682_v55 = vmul.f32 %v1666_v14, %v1458_v35  ;;  %v3484_v14 = vld [vmem:[#allocation14_spill] sm:$0xff] }
 0x2f4   : > { %v1611_v42 = vmul.f32 %v3017_v24, %v1595_v54  ;;  %v1137_v34 = vadd.f32 %v1121_v20, %v1101_v58  ;;  %v1825_v27 = vmul.f32 %v1809_v40, %v3010_v43  ;;  %v3065_v15 = vmul.f32 0.5, %v2936_v51  ;;  %v3482_v40 = vld [vmem:[#allocation13_spill] sm:$0xff] }
 0x2f5   : > { %v1594_v28 = vadd.f32 -0.28449672, %v1578_v44  ;;  %vm1755_vm11 = vcmp.ge.f32.partialorder %v2931_v10, 0.0  ;;  %v1138_v61 = vadd.f32 %v1122_v22, %v1102_v29  ;;  %v1683_v21 = vmul.f32 %v1667_v23, %v1459_v46  ;;  %v3483_v29 = vld [vmem:[#allocation19_spill] sm:$0xff]  ;;  %v3485_v23 = vld [vmem:[#allocation21_spill] sm:$0xff] }
 0x2f6   : > { %v1627_v17 = vadd.f32 0.2548296, %v1611_v42  ;;  %v1173_v50 = vadd.f32 %v1157_v48, %v1137_v34  ;;  %v1329_v18 = vmul.f32 %v2659_v39, %v2895_v4  ;;  %v1836_v60 = vpack.c.bf16 %v1825_v27, %v1824_v12  ;;  %v881_v27 = vld [vmem:[#allocation2 + $0x87] sm:$0xff] }
 0x2f7   : > { %v2294_v33 = vpop.eup %2293  ;;  %v1610_v35 = vmul.f32 %v3030_v63, %v1594_v28  ;;  %v1174_v58 = vadd.f32 %v1158_v3, %v1138_v61  ;;  %v1330_v43 = vmul.f32 %v2659_v39, %v2893_v5  ;;  %v1708_v20 = vmul.f32 1.442695, %v1682_v55 }
 0x2f8   : > { %v1643_v51 = vmul.f32 %v3017_v24, %v1627_v17  ;;  %v1309_v44 = vadd.f32 %v3482_v40, %v1173_v50  ;;  %v1365_v46 = vmul.f32 %v2652_v36, %v3483_v29  ;;  %2210 = vmatprep.mubr.msk.bf16.mxu1 %vm307_vm1, %v1836_v60  ;;  %v1366_v49 = vmul.f32 %v2652_v36, %v3485_v23  ;;  %v3088_v50 = vld [vmem:[#allocation2 + $0x8f] sm:$0xff] }
 0x2f9   : > { %v2296_v22 = vpop.eup %2295  ;;  %v1626_v48 = vadd.f32 0.2548296, %v1610_v35  ;;  %v1310_v30 = vadd.f32 %v3484_v14, %v1174_v58  ;;  %v621_v1 = vadd.s32 128, %v2573_v19  ;;  %v1001_v24 = vmul.f32 %v2589_v32, %v2927_v37  ;;  %3486 = vst [vmem:[#allocation5_spill] sm:$0xff] %v3088_v50  ;;  %v3487_v60 = vld [vmem:[#allocation18_spill] sm:$0xff] }
 0x2fa   : > { %v1723_v54 = vmul.f32 %v2294_v33, %v1643_v51  ;;  %v1345_v3 = vadd.f32 %v1329_v18, %v1309_v44  ;;  %v1002_v12 = vmul.f32 %v2589_v32, %v2922_v41  ;;  %vm1754_vm12 = vcmp.ge.f32.partialorder %v2954_v2, 0.0 }
 0x2fb   : > { %v1642_v42 = vmul.f32 %v3030_v63, %v1626_v48  ;;  %v1346_v55 = vadd.f32 %v1330_v43, %v1310_v30  ;;  %v741_v34 = vand.u32 15, %v621_v1  ;;  %2301 = vpow2.f32 %v1708_v20  ;;  %v3488_v43 = vld [vmem:[#allocation17_spill] sm:$0xff] }
 0x2fc   : > { %v1739_v28 = vsub.f32 1.0, %v1723_v54  ;;  %v1710_v61 = vmul.f32 1.442695, %v1683_v21  ;;  %v1381_v17 = vadd.f32 %v1365_v46, %v1345_v3  ;;  %v1017_v35 = vadd.f32 %v1001_v24, %v3487_v60 }
 0x2fd   : > { %v1722_v18 = vmul.f32 %v2296_v22, %v1642_v42  ;;  %v1382_v33 = vadd.f32 %v1366_v49, %v1346_v55  ;;  %vm901_vm13 = vcmp.ge.s32.totalorder %v741_v34, 1  ;;  %v1018_v40 = vadd.f32 %v1002_v12, %v3488_v43 }
 0x2fe   : > { %v1771_v58 = vsub.f32 0.0, %v1739_v28  ;;  %v3092_v51 = vadd.f32 %v2702_v11, %v1381_v17  ;;  %v3094_v63 = vsel %vm901_vm13, %v881_v27, 0.0  ;;  %v1038_v22 = vmul.f32 %v2602_v47, %v3088_v50 }
 0x2ff   : > { %v3097_v44 = vpop.eup %2297  ;;  %v1738_v20 = vsub.f32 1.0, %v1722_v18  ;;  %v3100_v21 = vadd.f32 %v2702_v11, %v1382_v33  ;;  %v1037_v46 = vmul.f32 %v2602_v47, %v3094_v63  ;;  %2303 = vpow2.f32 %v1710_v61 }
 0x300   : > { %v3106_v48 = vpop.eup %2299  ;;  %v1787_v14 = vsel %vm1755_vm11, %v1739_v28, %v1771_v58  ;;  %v1522_v30 = vmul.f32 1.0614054, %v3097_v44  ;;  %v3112_v49 = vmul.f32 0.70710677, %v3092_v51  ;;  %v622_v24 = vadd.s32 136, %v2573_v19 }
 0x301   : > { %v1770_v1 = vsub.f32 0.0, %v1738_v20  ;;  %v1803_v54 = vadd.f32 1.0, %v1787_v14  ;;  %v1523_v3 = vmul.f32 1.0614054, %v3106_v48  ;;  %v3117_v42 = vmul.f32 0.70710677, %v3100_v21 }
 0x302   : > { %v1538_v12 = vadd.f32 -1.4531521, %v1522_v30  ;;  %v1452_v55 = vand.u32 2147483647, %v3112_v49  ;;  %v1053_v10 = vadd.f32 %v1037_v46, %v1017_v35  ;;  %v1054_v61 = vadd.f32 %v1038_v22, %v1018_v40  ;;  %v3489_v14 = vld [vmem:[#allocation23_spill] sm:$0xff] }
 0x303   : > { %v1786_v34 = vsel %vm1754_vm12, %v1738_v20, %v1770_v1  ;;  %v1819_v27 = vmul.f32 %v1803_v54, %v3037_v8  ;;  %v1539_v28 = vadd.f32 -1.4531521, %v1523_v3  ;;  %v1453_v33 = vand.u32 2147483647, %v3117_v42  ;;  %v3130_v54 = vld [vmem:[#allocation2 + $0x88] sm:$0xff]  ;;  %v3490_v3 = vld [vmem:[#allocation24_spill] sm:$0xff] }
 0x304   : > { %v1802_v17 = vadd.f32 1.0, %v1786_v34  ;;  %v1554_v18 = vmul.f32 %v3097_v44, %v1538_v12  ;;  %v1468_v60 = vmul.f32 0.3275911, %v1452_v55  ;;  %v1660_v43 = vsub.f32 0.0, %v1452_v55 }
 0x305   : > { %v1555_v58 = vmul.f32 %v3106_v48, %v1539_v28  ;;  %v1109_v30 = vadd.f32 %v3489_v14, %v1053_v10  ;;  %v1129_v35 = vmul.f32 %v3478_v59, %v2965_v9  ;;  %v1469_v8 = vmul.f32 0.3275911, %v1453_v33 }
 0x306   : > { %v1818_v2 = vmul.f32 %v1802_v17, %v3065_v15  ;;  %v1570_v20 = vadd.f32 1.4214138, %v1554_v18  ;;  %v1484_v46 = vadd.f32 1.0, %v1468_v60  ;;  %v1661_v22 = vsub.f32 0.0, %v1453_v33  ;;  %v3138_v18 = vld [vmem:[#allocation2 + $0x90] sm:$0xff] }
 0x307   : > { %v1571_v40 = vadd.f32 1.4214138, %v1555_v58  ;;  %v748_v1 = vand.u32 15, %v622_v24  ;;  %v1110_v12 = vadd.f32 %v3490_v3, %v1054_v61  ;;  %v1485_v50 = vadd.f32 1.0, %v1469_v8  ;;  %v1202_v58 = vld [vmem:[#allocation2 + $0x91] sm:$0xff] }
 0x308   : > { %v1833_v34 = vpack.c.bf16 %v1819_v27, %v1818_v2  ;;  %v1586_v28 = vmul.f32 %v3097_v44, %v1570_v20  ;;  %2305 = vrcp.f32 %v1484_v46  ;;  %v2302_v10 = vpop.eup %2301  ;;  %v3135_v14 = vmul.f32 0.5, %v3021_v53 }
 0x309   : > { %v1587_v15 = vmul.f32 %v3106_v48, %v1571_v40  ;;  %v1676_v17 = vmul.f32 %v1660_v43, %v1452_v55  ;;  %v1130_v24 = vmul.f32 %v3478_v59, %v2974_v7  ;;  %2307 = vrcp.f32 %v1485_v50  ;;  %v3151_v40 = vld [vmem:[#allocation2 + $0x89] sm:$0xff] }
 0x30a   : > { %2203 = vmatmul.mubr.msk.bf16.vlgmr.msra.gmra.mxu0 %vm307_vm1, %v1833_v34  ;;  %v1602_v61 = vadd.f32 -0.28449672, %v1586_v28  ;;  %v1145_v27 = vadd.f32 %v1129_v35, %v1109_v30  ;;  %v1165_v60 = vmul.f32 %v2617_v0, %v3130_v54  ;;  %v3146_v53 = vmul.f32 0.5, %v3027_v13 }
 0x30b   : > { %v1603_v2 = vadd.f32 -0.28449672, %v1587_v15  ;;  %v1677_v20 = vmul.f32 %v1661_v22, %v1453_v33  ;;  %v1146_v55 = vadd.f32 %v1130_v24, %v1110_v12  ;;  %v1166_v8 = vmul.f32 %v2617_v0, %v3138_v18 }
 0x30c   : > { %v1618_v43 = vmul.f32 %v3097_v44, %v1602_v61  ;;  %v1181_v46 = vadd.f32 %v1165_v60, %v1145_v27  ;;  %vm1222_vm14 = vcmp.lt.s32.totalorder %v748_v1, 15  ;;  %v2304_v50 = vpop.eup %2303  ;;  %v1696_v35 = vmul.f32 1.442695, %v1676_v17  ;;  %v3491_v61 = vld [vmem:[#allocation28_spill] sm:$0xff] }
 0x30d   : > { %v1619_v30 = vmul.f32 %v3106_v48, %v1603_v2  ;;  %v3154_v3 = vsel %vm1222_vm14, %v1202_v58, 0.0  ;;  %v1337_v13 = vmul.f32 %v2659_v39, %v2979_v45  ;;  %v1182_v22 = vadd.f32 %v1166_v8, %v1146_v55 }
 0x30e   : > { %v1634_v33 = vadd.f32 0.2548296, %v1618_v43  ;;  %v1317_v12 = vadd.f32 %v2902_v25, %v1181_v46  ;;  %v1338_v34 = vmul.f32 %v2659_v39, %v2991_v52  ;;  %v1373_v1 = vmul.f32 %v2652_v36, %v3151_v40 }
 0x30f   : > { %v1635_v28 = vadd.f32 0.2548296, %v1619_v30  ;;  %v1374_v15 = vmul.f32 %v2652_v36, %v3154_v3  ;;  %v975_v17 = vmul.f32 %v2586_v31, %v2855_v62  ;;  %v1318_v27 = vadd.f32 %v3491_v61, %v1182_v22  ;;  %v3492_v30 = vld [vmem:[#allocation10_spill] sm:$0xff] }
 0x310   : > { %v1650_v24 = vmul.f32 %v3097_v44, %v1634_v33  ;;  %v1353_v60 = vadd.f32 %v1337_v13, %v1317_v12  ;;  %v976_v25 = vmul.f32 %v2586_v31, %v2819_v38  ;;  %v1698_v2 = vmul.f32 1.442695, %v1677_v20  ;;  %v3493_v33 = vld [vmem:[#allocation9_spill] sm:$0xff] }
 0x311   : > { %v1651_v58 = vmul.f32 %v3106_v48, %v1635_v28  ;;  %v995_v55 = vmul.f32 %v2589_v32, %v2706_v16  ;;  %v996_v36 = vmul.f32 %v2589_v32, %v2691_v6  ;;  %2309 = vpow2.f32 %v1696_v35  ;;  %v3495_v28 = vld [vmem:[#allocation3_spill] sm:$0xff] }
 0x312   : > { %v1730_v43 = vmul.f32 %v2302_v10, %v1650_v24  ;;  %v1354_v62 = vadd.f32 %v1338_v34, %v1318_v27  ;;  %v1389_v8 = vadd.f32 %v1373_v1, %v1353_v60  ;;  %v1031_v13 = vmul.f32 %v2602_v47, %v3492_v30  ;;  %v3494_v34 = vld [vmem:[#allocation26_spill] sm:$0xff] }
 0x313   : > { %v1731_v44 = vmul.f32 %v2304_v50, %v1651_v58  ;;  %v1011_v46 = vadd.f32 %v995_v55, %v975_v17  ;;  %v1032_v38 = vmul.f32 %v2602_v47, %v3493_v33  ;;  %v1012_v16 = vadd.f32 %v996_v36, %v976_v25 }
 0x314   : > { %v1746_v48 = vsub.f32 1.0, %v1730_v43  ;;  %v1390_v20 = vadd.f32 %v1374_v15, %v1354_v62  ;;  %v3181_v22 = vadd.f32 %v2702_v11, %v1389_v8  ;;  %vm1762_vm15 = vcmp.ge.f32.partialorder %v3034_v26, 0.0  ;;  %v3496_v26 = vld [vmem:[#allocation25_spill] sm:$0xff] }
 0x315   : > { %v3183_v12 = vpop.eup %2305  ;;  %v1747_v6 = vsub.f32 1.0, %v1731_v44  ;;  %vm1763_vm0 = vcmp.ge.f32.partialorder %v3041_v56, 0.0  ;;  %2311 = vpow2.f32 %v1698_v2  ;;  %v1087_v1 = vmul.f32 %v3495_v28, %v3494_v34  ;;  %v3497_v44 = vld [vmem:[#allocation11_spill] sm:$0xff] }
 0x316   : > { %v1778_v10 = vsub.f32 0.0, %v1746_v48  ;;  %v1516_v50 = vmul.f32 1.0614054, %v3183_v12  ;;  %v3189_v35 = vadd.f32 %v2702_v11, %v1390_v20  ;;  %v3193_v15 = vpop.eup %2307  ;;  %v3196_v24 = vmul.f32 0.70710677, %v3181_v22 }
 0x317   : > { %v1779_v17 = vsub.f32 0.0, %v1747_v6  ;;  %v1047_v61 = vadd.f32 %v1031_v13, %v1011_v46  ;;  %v1088_v56 = vmul.f32 %v3495_v28, %v3496_v26  ;;  %v1517_v60 = vmul.f32 1.0614054, %v3193_v15 }
 0x318   : > { %v1794_v27 = vsel %vm1762_vm15, %v1746_v48, %v1778_v10  ;;  %v1532_v25 = vadd.f32 -1.4531521, %v1516_v50  ;;  %v1048_v58 = vadd.f32 %v1032_v38, %v1012_v16  ;;  %v3202_v55 = vmul.f32 0.70710677, %v3189_v35 }
 0x319   : > { %v1795_v11 = vsel %vm1763_vm0, %v1747_v6, %v1779_v17  ;;  %v1810_v2 = vadd.f32 1.0, %v1794_v27  ;;  %v1460_v36 = vand.u32 2147483647, %v3196_v24  ;;  %v1533_v62 = vadd.f32 -1.4531521, %v1517_v60 }
 0x31a   : > { %v1811_v43 = vadd.f32 1.0, %v1795_v11  ;;  %v1548_v8 = vmul.f32 %v3183_v12, %v1532_v25  ;;  %v1123_v46 = vmul.f32 %v3478_v59, %v3497_v44  ;;  %v1461_v13 = vand.u32 2147483647, %v3202_v55 }
 0x31b   : > { %v1826_v30 = vmul.f32 %v1810_v2, %v3135_v14  ;;  %v1476_v33 = vmul.f32 0.3275911, %v1460_v36  ;;  %v1103_v38 = vadd.f32 %v1087_v1, %v1047_v61  ;;  %v1549_v20 = vmul.f32 %v3193_v15, %v1533_v62  ;;  %v3498_v2 = vld [vmem:[#allocation15_spill] sm:$0xff]  ;;  %v3499_v62 = vld [vmem:[#allocation16_spill] sm:$0xff] }
 0x31c   : > { %v1827_v48 = vmul.f32 %v1811_v43, %v3146_v53  ;;  %v1564_v16 = vadd.f32 1.4214138, %v1548_v8  ;;  %v1104_v6 = vadd.f32 %v1088_v56, %v1048_v58  ;;  %v1477_v10 = vmul.f32 0.3275911, %v1461_v13 }
 0x31d   : > { %v1492_v50 = vadd.f32 1.0, %v1476_v33  ;;  %v1668_v34 = vsub.f32 0.0, %v1460_v36  ;;  %v1565_v26 = vadd.f32 1.4214138, %v1549_v20  ;;  %v1124_v14 = vmul.f32 %v3478_v59, %v3481_v57 }
 0x31e   : > { %v1837_v17 = vpack.c.bf16 %v1827_v48, %v1826_v30  ;;  %v1580_v27 = vmul.f32 %v3183_v12, %v1564_v16  ;;  %v2310_v60 = vpop.eup %2309  ;;  %v1493_v25 = vadd.f32 1.0, %v1477_v10  ;;  %v1669_v1 = vsub.f32 0.0, %v1461_v13  ;;  %v3500_v48 = vld [vmem:[#allocation6_spill] sm:$0xff] }
 0x31f   : > { %2313 = vrcp.f32 %v1492_v50  ;;  %v1581_v53 = vmul.f32 %v3193_v15, %v1565_v26  ;;  %v1139_v56 = vadd.f32 %v1123_v46, %v1103_v38  ;;  %v1140_v58 = vadd.f32 %v1124_v14, %v1104_v6 }
 0x320   : > { %2211 = vmatmul.mubr.msk.bf16.vlgmr.msra.gmra.mxu1 %vm307_vm1, %v1837_v17  ;;  %v1596_v61 = vadd.f32 -0.28449672, %v1580_v27  ;;  %v3218_v11 = vmul.f32 0.5, %v3092_v51  ;;  %2315 = vrcp.f32 %v1493_v25  ;;  %v1159_v43 = vmul.f32 %v2617_v0, %v3498_v2 }
 0x321   : > { %v1160_v57 = vmul.f32 %v2617_v0, %v3499_v62  ;;  %v1597_v44 = vadd.f32 -0.28449672, %v1581_v53  ;;  %v1684_v33 = vmul.f32 %v1668_v34, %v1460_v36  ;;  %v1295_v20 = vmul.f32 %v3500_v48, %v2895_v4  ;;  %v3237_v4 = vld [vmem:[%s3413_s3 + $0x8] ss:$0 sm:$0xff] }
 0x322   : > { %v2312_v8 = vpop.eup %2311  ;;  %v1612_v30 = vmul.f32 %v3183_v12, %v1596_v61  ;;  %v1685_v46 = vmul.f32 %v1669_v1, %v1461_v13  ;;  %v1175_v38 = vadd.f32 %v1159_v43, %v1139_v56  ;;  %v1296_v51 = vmul.f32 %v3500_v48, %v2893_v5  ;;  %v3501_v13 = vld [vmem:[#allocation20_spill] sm:$0xff]  ;;  %v3502_v5 = vld [vmem:[#allocation22_spill] sm:$0xff] }
 0x323   : > { %v1176_v16 = vadd.f32 %v1160_v57, %v1140_v58  ;;  %v1613_v6 = vmul.f32 %v3193_v15, %v1597_v44  ;;  %v1331_v50 = vmul.f32 %v2659_v39, %v3483_v29  ;;  %v1332_v17 = vmul.f32 %v2659_v39, %v3485_v23 }
 0x324   : > { %v1628_v10 = vadd.f32 0.2548296, %v1612_v30  ;;  %v1311_v26 = vadd.f32 %v1295_v20, %v1175_v38  ;;  %v1367_v34 = vmul.f32 %v3237_v4, %v3501_v13  ;;  %v1368_v27 = vmul.f32 %v3237_v4, %v3502_v5  ;;  %v884_v20 = vld [vmem:[#allocation2 + $0x9f] sm:$0xff] }
 0x325   : > { %v1312_v36 = vadd.f32 %v1296_v51, %v1176_v16  ;;  %v1421_v14 = vmul.f32 0.5, %v3100_v21  ;;  %v1629_v25 = vadd.f32 0.2548296, %v1613_v6  ;;  %v623_v23 = vadd.s32 144, %v2573_v19  ;;  %v883_v21 = vld [vmem:[#allocation2 + $0x97] sm:$0xff]  ;;  %v3505_v6 = vld [vmem:[#allocation5_spill] sm:$0xff] }
 0x326   : > { %v1644_v29 = vmul.f32 %v3183_v12, %v1628_v10  ;;  %vm1756_vm3 = vcmp.ge.f32.partialorder %v3112_v49, 0.0  ;;  %v1712_v1 = vmul.f32 1.442695, %v1684_v33  ;;  %v1347_v53 = vadd.f32 %v1331_v50, %v1311_v26 }
 0x327   : > { %v1348_v61 = vadd.f32 %v1332_v17, %v1312_v36  ;;  %v1645_v56 = vmul.f32 %v3193_v15, %v1629_v25  ;;  %vm1757_vm4 = vcmp.ge.f32.partialorder %v3117_v42, 0.0  ;;  %v755_v2 = vand.u32 15, %v623_v23 }
 0x328   : > { %v1724_v58 = vmul.f32 %v2310_v60, %v1644_v29  ;;  %v1714_v43 = vmul.f32 1.442695, %v1685_v46  ;;  %v1383_v62 = vadd.f32 %v1367_v34, %v1347_v53  ;;  %v983_v12 = vmul.f32 %v2586_v31, %v2927_v37  ;;  %v3260_v60 = vld [vmem:[%s3414_s4] ss:$0 sm:$0xff] }
 0x329   : > { %v1384_v57 = vadd.f32 %v1368_v27, %v1348_v61  ;;  %v1725_v44 = vmul.f32 %v2312_v8, %v1645_v56  ;;  %vm3251_vm5 = vcmp.ge.s32.totalorder %v755_v2, 1  ;;  %v1003_v15 = vmul.f32 %v2589_v32, %v3094_v63 }
 0x32a   : > { %v1740_v30 = vsub.f32 1.0, %v1724_v58  ;;  %2317 = vpow2.f32 %v1712_v1  ;;  %v3263_v46 = vadd.f32 %v3260_v60, %v1383_v62  ;;  %v984_v8 = vmul.f32 %v2586_v31, %v2922_v41 }
 0x32b   : > { %v3266_v37 = vadd.f32 %v3260_v60, %v1384_v57  ;;  %v1741_v16 = vsub.f32 1.0, %v1725_v44  ;;  %v963_v63 = vsel %vm3251_vm5, %v883_v21, 0.0  ;;  %v1004_v10 = vmul.f32 %v2589_v32, %v3505_v6  ;;  %v1076_v6 = vld [vmem:[#allocation2 + $0xa0] sm:$0xff] }
 0x32c   : > { %v3270_v38 = vpop.eup %2313  ;;  %v1772_v51 = vsub.f32 0.0, %v1740_v30  ;;  %2319 = vpow2.f32 %v1714_v43  ;;  %v3278_v17 = vmul.f32 0.70710677, %v3263_v46  ;;  %v1040_v26 = vmul.f32 %v2602_v47, %v884_v20 }
 0x32d   : > { %v1524_v50 = vmul.f32 1.0614054, %v3270_v38  ;;  %v3281_v36 = vpop.eup %2315  ;;  %v1773_v31 = vsub.f32 0.0, %v1741_v16  ;;  %v3286_v13 = vmul.f32 0.70710677, %v3266_v37  ;;  %v1019_v34 = vadd.f32 %v1003_v15, %v983_v12 }
 0x32e   : > { %v1788_v41 = vsel %vm1756_vm3, %v1740_v30, %v1772_v51  ;;  %v1525_v32 = vmul.f32 1.0614054, %v3281_v36  ;;  %v1039_v25 = vmul.f32 %v2602_v47, %v963_v63  ;;  %v1454_v23 = vand.u32 2147483647, %v3278_v17  ;;  %v1075_v51 = vld [vmem:[#allocation2 + $0x98] sm:$0xff] }
 0x32f   : > { %v1804_v5 = vadd.f32 1.0, %v1788_v41  ;;  %v1540_v27 = vadd.f32 -1.4531521, %v1524_v50  ;;  %v1789_v29 = vsel %vm1757_vm4, %v1741_v16, %v1773_v31  ;;  %v1455_v1 = vand.u32 2147483647, %v3286_v13 }
 0x330   : > { %v1020_v53 = vadd.f32 %v1004_v10, %v984_v8  ;;  %v1805_v49 = vadd.f32 1.0, %v1789_v29  ;;  %v1541_v56 = vadd.f32 -1.4531521, %v1525_v32  ;;  %v1470_v2 = vmul.f32 0.3275911, %v1454_v23 }
 0x331   : > { %v1820_v61 = vmul.f32 %v1804_v5, %v3218_v11  ;;  %v1556_v58 = vmul.f32 %v3270_v38, %v1540_v27  ;;  %v1471_v43 = vmul.f32 0.3275911, %v1455_v1  ;;  %v624_v62 = vadd.s32 152, %v2573_v19 }
 0x332   : > { %v1821_v57 = vmul.f32 %v1805_v49, %v1421_v14  ;;  %v1557_v47 = vmul.f32 %v3281_v36, %v1541_v56  ;;  %v1055_v21 = vadd.f32 %v1039_v25, %v1019_v34  ;;  %v1486_v12 = vadd.f32 1.0, %v1470_v2  ;;  %v1204_v34 = vld [vmem:[#allocation2 + $0xa1] sm:$0xff] }
 0x333   : > { %v1572_v42 = vadd.f32 1.4214138, %v1556_v58  ;;  %v1487_v44 = vadd.f32 1.0, %v1471_v43  ;;  %v1662_v30 = vsub.f32 0.0, %v1454_v23  ;;  %v1056_v20 = vadd.f32 %v1040_v26, %v1020_v53 }
 0x334   : > { %v1834_v33 = vpack.c.bf16 %v1821_v57, %v1820_v61  ;;  %v1573_v15 = vadd.f32 1.4214138, %v1557_v47  ;;  %v1095_v8 = vmul.f32 %v3495_v28, %v2965_v9  ;;  %2321 = vrcp.f32 %v1486_v12 }
 0x335   : > { %v1588_v11 = vmul.f32 %v3270_v38, %v1572_v42  ;;  %v762_v16 = vand.u32 15, %v624_v62  ;;  %v1096_v19 = vmul.f32 %v3495_v28, %v2974_v7  ;;  %2323 = vrcp.f32 %v1487_v44 }
 0x336   : > { %2206 = vmatprep.mubr.msk.bf16.mxu0 %vm307_vm1, %v1834_v33  ;;  %v1589_v14 = vmul.f32 %v3281_v36, %v1573_v15  ;;  %v1111_v10 = vadd.f32 %v1095_v8, %v1055_v21  ;;  %v1663_v26 = vsub.f32 0.0, %v1455_v1  ;;  %v1131_v9 = vmul.f32 %v3478_v59, %v3130_v54 }
 0x337   : > { %v1604_v63 = vadd.f32 -0.28449672, %v1588_v11  ;;  %v2318_v50 = vpop.eup %2317  ;;  %v1112_v31 = vadd.f32 %v1096_v19, %v1056_v20  ;;  %v1132_v41 = vmul.f32 %v3478_v59, %v3138_v18  ;;  %v1678_v28 = vmul.f32 %v1662_v30, %v1454_v23  ;;  %v1203_v59 = vld [vmem:[#allocation2 + $0x99] sm:$0xff] }
 0x338   : > { %v1605_v5 = vadd.f32 -0.28449672, %v1589_v14  ;;  %v1167_v32 = vmul.f32 %v2617_v0, %v1075_v51  ;;  %v1147_v25 = vadd.f32 %v1131_v9, %v1111_v10  ;;  %v1168_v53 = vmul.f32 %v2617_v0, %v1076_v6 }
 0x339   : > { %v1620_v7 = vmul.f32 %v3270_v38, %v1604_v63  ;;  %v2320_v27 = vpop.eup %2319  ;;  %v1148_v29 = vadd.f32 %v1132_v41, %v1112_v31  ;;  %vm3312_vm6 = vcmp.lt.s32.totalorder %v762_v16, 15  ;;  %v1303_v23 = vmul.f32 %v3500_v48, %v2979_v45 }
 0x33a   : > { %v1621_v54 = vmul.f32 %v3281_v36, %v1605_v5  ;;  %v1284_v18 = vsel %vm3312_vm6, %v1204_v34, 0.0  ;;  %v1183_v56 = vadd.f32 %v1167_v32, %v1147_v25  ;;  %v1304_v2 = vmul.f32 %v3500_v48, %v2991_v52 }
 0x33b   : > { %v1636_v61 = vadd.f32 0.2548296, %v1620_v7  ;;  %v1184_v58 = vadd.f32 %v1168_v53, %v1148_v29  ;;  %v1339_v0 = vmul.f32 %v2659_v39, %v3151_v40  ;;  %v1679_v57 = vmul.f32 %v1663_v26, %v1455_v1 }
 0x33c   : > { %v1637_v43 = vadd.f32 0.2548296, %v1621_v54  ;;  %v1340_v47 = vmul.f32 %v2659_v39, %v3154_v3  ;;  %v1319_v42 = vadd.f32 %v1303_v23, %v1183_v56  ;;  %v1375_v12 = vmul.f32 %v3237_v4, %v1203_v59 }
 0x33d   : > { %v1652_v62 = vmul.f32 %v3270_v38, %v1636_v61  ;;  %v1320_v21 = vadd.f32 %v1304_v2, %v1184_v58  ;;  %v1376_v45 = vmul.f32 %v3237_v4, %v1284_v18  ;;  %v1700_v33 = vmul.f32 1.442695, %v1678_v28 }
 0x33e   : > { %v1653_v44 = vmul.f32 %v3281_v36, %v1637_v43  ;;  %v1355_v52 = vadd.f32 %v1339_v0, %v1319_v42  ;;  %vm1764_vm7 = vcmp.ge.f32.partialorder %v3196_v24, 0.0  ;;  %v1702_v38 = vmul.f32 1.442695, %v1679_v57 }
 0x33f   : > { %v1732_v30 = vmul.f32 %v2318_v50, %v1652_v62  ;;  %v1356_v48 = vadd.f32 %v1340_v47, %v1320_v21  ;;  %v1428_v3 = vmul.f32 0.5, %v3181_v22  ;;  %vm1765_vm8 = vcmp.ge.f32.partialorder %v3202_v55, 0.0 }
 0x340   : > { %v1733_v20 = vmul.f32 %v2320_v27, %v1653_v44  ;;  %v1391_v1 = vadd.f32 %v1375_v12, %v1355_v52  ;;  %2325 = vpow2.f32 %v1700_v33  ;;  %v1429_v63 = vmul.f32 0.5, %v3189_v35 }
 0x341   : > { %v1748_v40 = vsub.f32 1.0, %v1732_v30  ;;  %v1392_v15 = vadd.f32 %v1376_v45, %v1356_v48  ;;  %v2322_v39 = vpop.eup %2321  ;;  %2327 = vpow2.f32 %v1702_v38  ;;  %vm1758_vm9 = vcmp.ge.f32.partialorder %v3278_v17, 0.0 }
 0x342   : > { %v1749_v11 = vsub.f32 1.0, %v1733_v20  ;;  %v2324_v16 = vpop.eup %2323  ;;  %v1518_v4 = vmul.f32 1.0614054, %v2322_v39  ;;  %v3335_v36 = vadd.f32 %v3260_v60, %v1391_v1  ;;  %vm1759_vm10 = vcmp.ge.f32.partialorder %v3286_v13, 0.0 }
 0x343   : > { %v1780_v8 = vsub.f32 0.0, %v1748_v40  ;;  %v3338_v51 = vadd.f32 %v3260_v60, %v1392_v15  ;;  %v1519_v14 = vmul.f32 1.0614054, %v2324_v16  ;;  %v1422_v48 = vmul.f32 0.5, %v3263_v46 }
 0x344   : > { %v1781_v19 = vsub.f32 0.0, %v1749_v11  ;;  %v1534_v22 = vadd.f32 -1.4531521, %v1518_v4  ;;  %v3342_v55 = vmul.f32 0.70710677, %v3335_v36  ;;  %v1423_v38 = vmul.f32 0.5, %v3266_v37 }
 0x345   : > { %v1796_v24 = vsel %vm1764_vm7, %v1748_v40, %v1780_v8  ;;  %v1535_v50 = vadd.f32 -1.4531521, %v1519_v14  ;;  %v3345_v26 = vmul.f32 0.70710677, %v3338_v51 }
 0x346   : > { %v1812_v6 = vadd.f32 1.0, %v1796_v24  ;;  %v1797_v10 = vsel %vm1765_vm8, %v1749_v11, %v1781_v19  ;;  %v1550_v9 = vmul.f32 %v2322_v39, %v1534_v22  ;;  %v1462_v34 = vand.u32 2147483647, %v3342_v55 }
 0x347   : > { %v1813_v31 = vadd.f32 1.0, %v1797_v10  ;;  %v1551_v41 = vmul.f32 %v2324_v16, %v1535_v50  ;;  %v1463_v5 = vand.u32 2147483647, %v3345_v26  ;;  %vm1766_vm11 = vcmp.ge.f32.partialorder %v3342_v55, 0.0  ;;  %v2130_v55 = vld [vmem:[%s3416_s6] ss:$0 sm:$0xff] }
 0x348   : > { %v1828_v60 = vmul.f32 %v1812_v6, %v1428_v3  ;;  %v1566_v7 = vadd.f32 1.4214138, %v1550_v9  ;;  %v1478_v32 = vmul.f32 0.3275911, %v1462_v34  ;;  %v1670_v43 = vsub.f32 0.0, %v1462_v34 }
 0x349   : > { %v1829_v35 = vmul.f32 %v1813_v31, %v1429_v63  ;;  %v1567_v28 = vadd.f32 1.4214138, %v1551_v41  ;;  %v1479_v27 = vmul.f32 0.3275911, %v1463_v5  ;;  %v1671_v57 = vsub.f32 0.0, %v1463_v5 }
 0x34a   : > { %v1582_v29 = vmul.f32 %v2322_v39, %v1566_v7  ;;  %v1494_v49 = vadd.f32 1.0, %v1478_v32  ;;  %v1686_v12 = vmul.f32 %v1670_v43, %v1462_v34  ;;  %vm1767_vm12 = vcmp.ge.f32.partialorder %v3345_v26, 0.0 }
 0x34b   : > { %v1838_v25 = vpack.c.bf16 %v1829_v35, %v1828_v60  ;;  %v1583_v53 = vmul.f32 %v2324_v16, %v1567_v28  ;;  %v1495_v54 = vadd.f32 1.0, %v1479_v27  ;;  %v1687_v44 = vmul.f32 %v1671_v57, %v1463_v5 }
 0x34c   : > { %v1598_v61 = vadd.f32 -0.28449672, %v1582_v29  ;;  %2329 = vrcp.f32 %v1494_v49  ;;  %v1716_v40 = vmul.f32 1.442695, %v1686_v12  ;;  %v1430_v49 = vmul.f32 0.5, %v3335_v36 }
 0x34d   : > { %2214 = vmatprep.mubr.msk.bf16.mxu1 %vm307_vm1, %v1838_v25  ;;  %v1599_v59 = vadd.f32 -0.28449672, %v1583_v53  ;;  %2331 = vrcp.f32 %v1495_v54  ;;  %v2326_v56 = vpop.eup %2325  ;;  %v1718_v15 = vmul.f32 1.442695, %v1687_v44 }
 0x34e   : > { %v1614_v18 = vmul.f32 %v2322_v39, %v1598_v61  ;;  %v2328_v2 = vpop.eup %2327  ;;  %2333 = vpow2.f32 %v1716_v40  ;;  %v1431_v61 = vmul.f32 0.5, %v3338_v51 }
 0x34f   : > { %v1615_v23 = vmul.f32 %v2324_v16, %v1599_v59  ;;  %2335 = vpow2.f32 %v1718_v15 }
 0x350   : > { %v1630_v58 = vadd.f32 0.2548296, %v1614_v18 }
 0x351   : > { %v1631_v0 = vadd.f32 0.2548296, %v1615_v23 }
 0x352   : > { %v1646_v62 = vmul.f32 %v2322_v39, %v1630_v58 }
 0x353   : > { %v1647_v47 = vmul.f32 %v2324_v16, %v1631_v0 }
 0x354   : > { %v1726_v42 = vmul.f32 %v2326_v56, %v1646_v62 }
 0x355   : > { %v1727_v21 = vmul.f32 %v2328_v2, %v1647_v47 }
 0x356   : > { %v1742_v45 = vsub.f32 1.0, %v1726_v42 }
 0x357   : > { %v1743_v30 = vsub.f32 1.0, %v1727_v21 }
 0x358   : > { %v1774_v52 = vsub.f32 0.0, %v1742_v45 }
 0x359   : > { %v1775_v20 = vsub.f32 0.0, %v1743_v30  ;;  %v2330_v33 = vpop.eup %2329 }
 0x35a   : > { %v1790_v1 = vsel %vm1758_vm9, %v1742_v45, %v1774_v52  ;;  %v2332_v39 = vpop.eup %2331  ;;  %v1526_v8 = vmul.f32 1.0614054, %v2330_v33 }
 0x35b   : > { %v1791_v3 = vsel %vm1759_vm10, %v1743_v30, %v1775_v20  ;;  %v1806_v11 = vadd.f32 1.0, %v1790_v1  ;;  %v1527_v4 = vmul.f32 1.0614054, %v2332_v39  ;;  %v2334_v34 = vpop.eup %2333 }
 0x35c   : > { %v1807_v16 = vadd.f32 1.0, %v1791_v3  ;;  %v1542_v17 = vadd.f32 -1.4531521, %v1526_v8  ;;  %v2336_v35 = vpop.eup %2335 }
 0x35d   : > { %v1822_v19 = vmul.f32 %v1806_v11, %v1422_v48  ;;  %v1543_v24 = vadd.f32 -1.4531521, %v1527_v4 }
 0x35e   : > { %v1823_v13 = vmul.f32 %v1807_v16, %v1423_v38  ;;  %v1558_v46 = vmul.f32 %v2330_v33, %v1542_v17 }
 0x35f   : > { %v1559_v63 = vmul.f32 %v2332_v39, %v1543_v24 }
 0x360   : > { %v1835_v14 = vpack.c.bf16 %v1823_v13, %v1822_v19  ;;  %v1574_v6 = vadd.f32 1.4214138, %v1558_v46 }
 0x361   : > { %v1575_v37 = vadd.f32 1.4214138, %v1559_v63 }
 0x362   : > { %2207 = vmatmul.mubr.msk.bf16.gmra.mxu0 %vm307_vm1, %v1835_v14  ;;  %v1590_v22 = vmul.f32 %v2330_v33, %v1574_v6 }
 0x363   : > { %v1591_v10 = vmul.f32 %v2332_v39, %v1575_v37 }
 0x364   : > { %v1606_v50 = vadd.f32 -0.28449672, %v1590_v22 }
 0x365   : > { %v1607_v31 = vadd.f32 -0.28449672, %v1591_v10 }
 0x366   : > { %v1622_v60 = vmul.f32 %v2330_v33, %v1606_v50 }
 0x367   : > { %v1623_v9 = vmul.f32 %v2332_v39, %v1607_v31 }
 0x368   : > { %v1638_v41 = vadd.f32 0.2548296, %v1622_v60 }
 0x369   : > { %v1639_v5 = vadd.f32 0.2548296, %v1623_v9 }
 0x36a   : > { %v1654_v7 = vmul.f32 %v2330_v33, %v1638_v41 }
 0x36b   : > { %v1655_v28 = vmul.f32 %v2332_v39, %v1639_v5 }
 0x36c   : > { %v1734_v32 = vmul.f32 %v2334_v34, %v1654_v7 }
 0x36d   : > { %v1735_v27 = vmul.f32 %v2336_v35, %v1655_v28 }
 0x36e   : > { %v1750_v25 = vsub.f32 1.0, %v1734_v32 }
 0x36f   : > { %v1751_v29 = vsub.f32 1.0, %v1735_v27 }
 0x370   : > { %v1782_v53 = vsub.f32 0.0, %v1750_v25 }
 0x371   : > { %v1783_v54 = vsub.f32 0.0, %v1751_v29 }
 0x372   : > { %v1798_v59 = vsel %vm1766_vm11, %v1750_v25, %v1782_v53 }
 0x373   : > { %v1799_v18 = vsel %vm1767_vm12, %v1751_v29, %v1783_v54  ;;  %v1814_v23 = vadd.f32 1.0, %v1798_v59 }
 0x374   : > { %v1815_v56 = vadd.f32 1.0, %v1799_v18 }
 0x375   : > { %v1830_v58 = vmul.f32 %v1814_v23, %v1430_v49 }
 0x376   : > { %v1831_v2 = vmul.f32 %v1815_v56, %v1431_v61 }
 0x378   : > { %v1839_v0 = vpack.c.bf16 %v1831_v2, %v1830_v58 }
 0x37a   : > { %2215 = vmatmul.mubr.msk.bf16.gmra.mxu1 %vm307_vm1, %v1839_v0 }
 0x3ca   : > { %v2204_v36 = vpop.f32.mrf.mxu0 }
 0x3cb   : > { %v1930_v26 = vadd.f32 %v2204_v36, %v2130_v55 }
 0x3cc   : > { %v1921_v51 = vpop.f32.mrf.mxu0 }
 0x3cd   : > { %1986 = vst.msk [vmem:[%s2489_s25 + $0x10] sm:$0xff] %vm347_vm2, %v1930_v26  ;;  %v1922_v43 = vadd.f32 %v2130_v55, %v1921_v51 }
 0x3ce   : > { %v2205_v62 = vpop.f32.mrf.mxu0 }
 0x3cf   : > { %1984 = vst.msk [vmem:[%s2489_s25] sm:$0xff] %vm347_vm2, %v1922_v43  ;;  %v1933_v57 = vadd.f32 %v2205_v62, %v2130_v55 }
 0x3d0   : > { %v1924_v47 = vpop.f32.mrf.mxu0 }
 0x3d1   : > { %1987 = vst.msk [vmem:[%s2489_s25 + $0x18] sm:$0xff] %vm347_vm2, %v1933_v57  ;;  %v1925_v42 = vadd.f32 %v2130_v55, %v1924_v47 }
 0x3d3   : > { %1985 = vst.msk [vmem:[%s2489_s25 + $0x8] sm:$0xff] %vm347_vm2, %v1925_v42 }
 0x3e0   : > { %v2212_v21 = vpop.f32.mrf.mxu1 }
 0x3e1   : > { %v1962_v12 = vadd.f32 %v2212_v21, %v2130_v55 }
 0x3e2   : > { %v1953_v45 = vpop.f32.mrf.mxu1 }
 0x3e3   : > { %1994 = vst.msk [vmem:[%s2489_s25 + $0x50] sm:$0xff] %vm347_vm2, %v1962_v12  ;;  %v1954_v44 = vadd.f32 %v2130_v55, %v1953_v45 }
 0x3e4   : > { %v2213_v30 = vpop.f32.mrf.mxu1 }
 0x3e5   : > { %1992 = vst.msk [vmem:[%s2489_s25 + $0x40] sm:$0xff] %vm347_vm2, %v1954_v44  ;;  %v1965_v52 = vadd.f32 %v2213_v30, %v2130_v55 }
 0x3e6   : > { %v1956_v48 = vpop.f32.mrf.mxu1 }
 0x3e7   : > { %1995 = vst.msk [vmem:[%s2489_s25 + $0x58] sm:$0xff] %vm347_vm2, %v1965_v52  ;;  %v1957_v20 = vadd.f32 %v2130_v55, %v1956_v48 }
 0x3e9   : > { %1993 = vst.msk [vmem:[%s2489_s25 + $0x48] sm:$0xff] %vm347_vm2, %v1957_v20 }
 0x422   : > { %v2208_v40 = vpop.f32.mrf.mxu0 }
 0x423   : > { %v1946_v33 = vadd.f32 %v2208_v40, %v2130_v55 }
 0x424   : > { %v1937_v38 = vpop.f32.mrf.mxu0 }
 0x425   : > { %1990 = vst.msk [vmem:[%s2489_s25 + $0x30] sm:$0xff] %vm347_vm2, %v1946_v33  ;;  %v1938_v1 = vadd.f32 %v2130_v55, %v1937_v38 }
 0x426   : > { %v2209_v15 = vpop.f32.mrf.mxu0 }
 0x427   : > { %1988 = vst.msk [vmem:[%s2489_s25 + $0x20] sm:$0xff] %vm347_vm2, %v1938_v1  ;;  %v1949_v39 = vadd.f32 %v2209_v15, %v2130_v55 }
 0x428   : > { %v1940_v3 = vpop.f32.mrf.mxu0 }
 0x429   : > { %1991 = vst.msk [vmem:[%s2489_s25 + $0x38] sm:$0xff] %vm347_vm2, %v1949_v39  ;;  %v1941_v11 = vadd.f32 %v2130_v55, %v1940_v3 }
 0x42b   : > { %1989 = vst.msk [vmem:[%s2489_s25 + $0x28] sm:$0xff] %vm347_vm2, %v1941_v11 }
 0x43a   : > { %v2216_v8 = vpop.f32.mrf.mxu1 }
 0x43b   : > { %v1978_v16 = vadd.f32 %v2216_v8, %v2130_v55 }
 0x43c   : > { %v1969_v4 = vpop.f32.mrf.mxu1 }
 0x43d   : > { %1998 = vst.msk [vmem:[%s2489_s25 + $0x70] sm:$0xff] %vm347_vm2, %v1978_v16  ;;  %v1970_v19 = vadd.f32 %v2130_v55, %v1969_v4 }
 0x43e   : > { %v2217_v17 = vpop.f32.mrf.mxu1 }
 0x43f   : > { %1996 = vst.msk [vmem:[%s2489_s25 + $0x60] sm:$0xff] %vm347_vm2, %v1970_v19  ;;  %v1981_v13 = vadd.f32 %v2217_v17, %v2130_v55 }
 0x440   : > { %v1972_v24 = vpop.f32.mrf.mxu1 }
 0x441   : > { %1999 = vst.msk [vmem:[%s2489_s25 + $0x78] sm:$0xff] %vm347_vm2, %v1981_v13  ;;  %v1973_v46 = vadd.f32 %v2130_v55, %v1972_v24 }
 0x443   : > { %1997 = vst.msk [vmem:[%s2489_s25 + $0x68] sm:$0xff] %vm347_vm2, %v1973_v46 }
 0x444 PF: > { %s17_s28 = sadd.s32 1, %s2377_s28   ;;  %s3508_s24 = smov %s2369_s26 }
 0x445   : > { %p14_p9 = scmp.ge.s32.totalorder %s17_s28, 6   ;;  %s3509_s25 = smov %s2373_s27 }
 0x446   : > { %s3510_s26 = smov %s3513_s29  ;;  %s3511_s27 = smov %s3517_s30 }
 0x447   :  { %16 = sbr.rel (!%p14_p9) target bundleno = 3 (0x3), region = 89 }

</bundles_post_ra>
